<compile_context>
chip_gen: v5e
topology: v5e:2x2
jax: 0.10.0
libtpu: 0.0.40
codegen_flags: <defaults>
</compile_context>

<pallas_src>
import functools

import jax
import jax.numpy as jnp
from jax.experimental import pallas as pl
from jax.experimental.pallas import tpu as pltpu


def _conv_kernel(x_ref, w_ref, b_ref, o_ref, *, kh_size, kw_size, stride,
                 h_out, w_out, c_in):
    # x_ref: (1, C_in, H_pad, W_pad)   padded NCHW image for this batch element
    # w_ref: (C_out, KH*KW*C_in)       pre-packed; K index = (kh*KW + kw)*C_in + ci
    # b_ref: (C_out, 1)
    # o_ref: (1, C_out, H_out*W_out)   lane-dense output (already NCHW, flat spatial)
    x = x_ref[0]                                           # (C_in, H_pad, W_pad)
    m = h_out * w_out

    # Build the im2col patch matrix (K, M) by stacking the tap slices along K,
    # then do ONE MXU matmul with K = KH*KW*C_in instead of KH*KW tiny dots.
    # TODO(synk): for stride > 1, push the stride into the ref load via
    # pl.ds(..., stride=stride) instead of strided-slicing the loaded value.
    taps = []
    for kh in range(kh_size):
        for kw in range(kw_size):
            patch = x[:,
                      kh:kh + (h_out - 1) * stride + 1:stride,
                      kw:kw + (w_out - 1) * stride + 1:stride]   # (C_in, H_out, W_out)
            taps.append(patch.reshape(c_in, m))
    patches = jnp.concatenate(taps, axis=0)                # (K, M)

    acc = jnp.dot(w_ref[...], patches,
                  preferred_element_type=jnp.float32)      # (C_out, M)
    acc = acc + b_ref[...].astype(jnp.float32)             # broadcast over lanes
    o_ref[0] = acc.astype(o_ref.dtype)


def conv_layer_forward(x_nchw, weight, bias, *, stride, padding):
    """Equivalent of ConvLayer.forward (nn.Conv2d) using a Pallas TPU kernel.

    x_nchw : (N, C_in, H, W)            -- PyTorch layout
    weight : (C_out, C_in, KH, KW)      -- PyTorch layout
    bias   : (C_out,)
    """
    n, c_in, h, w = x_nchw.shape
    c_out, _, kh_size, kw_size = weight.shape

    h_out = (h + 2 * padding - kh_size) // stride + 1
    w_out = (w + 2 * padding - kw_size) // stride + 1
    m = h_out * w_out
    k_total = kh_size * kw_size * c_in

    # --- glue (plain JAX): spatial padding + weight packing ------------------
    x_pad = jnp.pad(x_nchw, ((0, 0), (0, 0),
                             (padding, padding), (padding, padding)))
    h_pad, w_pad = x_pad.shape[2], x_pad.shape[3]

    # (C_out, C_in, KH, KW) -> (C_out, KH, KW, C_in) -> (C_out, KH*KW*C_in)
    # so that K index = (kh*KW + kw)*C_in + ci matches the kernel's concat order.
    w_packed = jnp.transpose(weight, (0, 2, 3, 1)).reshape(c_out, k_total)
    b_2d = bias.reshape(c_out, 1)

    kernel = functools.partial(
        _conv_kernel, kh_size=kh_size, kw_size=kw_size, stride=stride,
        h_out=h_out, w_out=w_out, c_in=c_in)

    out_flat = pl.pallas_call(
        kernel,
        out_shape=jax.ShapeDtypeStruct((n, c_out, m), x_nchw.dtype),
        grid_spec=pltpu.PrefetchScalarGridSpec(
            num_scalar_prefetch=0,
            grid=(n,),
            in_specs=[
                pl.BlockSpec((1, c_in, h_pad, w_pad), lambda b: (b, 0, 0, 0)),
                pl.BlockSpec((c_out, k_total), lambda b: (0, 0)),
                pl.BlockSpec((c_out, 1), lambda b: (0, 0)),
            ],
            out_specs=pl.BlockSpec((1, c_out, m), lambda b: (b, 0, 0)),
        ),
        compiler_params=pltpu.CompilerParams(
            dimension_semantics=("parallel",)),
    )(x_pad, w_packed, b_2d)

    # Output is already NCHW; this reshape is metadata-only (contiguous).
    return out_flat.reshape(n, c_out, h_out, w_out)


if __name__ == "__main__":
    # ConvLayer(in_channels=4, out_channels=8, kernel_size=3, stride=1, padding=1)
    in_channels, out_channels = 4, 8
    kernel_size, stride, padding = 3, 1, 1
    N, H, W = 2, 16, 16

    key = jax.random.PRNGKey(0)
    kx, kw, kb = jax.random.split(key, 3)

    x = jax.random.normal(kx, (N, in_channels, H, W), dtype=jnp.float32)

    # Deterministic parameter init (matches nn.Conv2d default init scheme:
    # uniform(-1/sqrt(fan_in), 1/sqrt(fan_in)) with fan_in = C_in*KH*KW).
    fan_in = in_channels * kernel_size * kernel_size
    bound = 1.0 / jnp.sqrt(jnp.float32(fan_in))
    weight = jax.random.uniform(
        kw, (out_channels, in_channels, kernel_size, kernel_size),
        minval=-bound, maxval=bound, dtype=jnp.float32)
    bias = jax.random.uniform(
        kb, (out_channels,), minval=-bound, maxval=bound, dtype=jnp.float32)

    out = conv_layer_forward(x, weight, bias, stride=stride, padding=padding)
    out = jax.block_until_ready(out)

    # Sanity check against XLA's reference convolution (NCHW, OIHW).
    ref = jax.lax.conv_general_dilated(
        x, weight, window_strides=(stride, stride),
        padding=((padding, padding), (padding, padding)),
        dimension_numbers=("NCHW", "OIHW", "NCHW"))
    ref = ref + bias.reshape(1, out_channels, 1, 1)
    assert out.shape == (N, out_channels, H, W)
    assert jnp.max(jnp.abs(out - ref)) < 1e-4

    print("KERNEL_OK")
</pallas_src>

<mosaic_0001>
module attributes {stable_mosaic.version = 11 : i64} {
  func.func @_conv_kernel(%arg0: i32, %arg1: memref<1x4x18x18xf32, #tpu.memory_space<vmem>>, %arg2: memref<8x36xf32, #tpu.memory_space<vmem>>, %arg3: memref<8x1xf32, #tpu.memory_space<vmem>>, %arg4: memref<1x8x256xf32, #tpu.memory_space<vmem>>) attributes {dimension_semantics = [#tpu.dimension_semantics<parallel>], iteration_bounds = array<i64: 2>, scalar_prefetch = 0 : i64, scratch_operands = 0 : i64, tpu.core_type = #tpu.core_type<tc>, window_params = [{transform_indices = @transform_0, window_bounds = array<i64: 1, 4, 18, 18>}, {pipeline_mode = #tpu.pipeline_mode<synchronous>, transform_indices = @transform_1, window_bounds = array<i64: 8, 36>}, {pipeline_mode = #tpu.pipeline_mode<synchronous>, transform_indices = @transform_2, window_bounds = array<i64: 8, 1>}, {transform_indices = @transform_3, window_bounds = array<i64: 1, 8, 256>}]} {
    %c0 = arith.constant 0 : index
    %c0_0 = arith.constant 0 : index
    %c0_1 = arith.constant 0 : index
    %c0_2 = arith.constant 0 : index
    %0 = vector.load %arg1[%c0, %c0_0, %c0_1, %c0_2] : memref<1x4x18x18xf32, #tpu.memory_space<vmem>>, vector<1x4x18x18xf32>
    %1 = vector.shape_cast %0 : vector<1x4x18x18xf32> to vector<4x18x18xf32>
    %2 = vector.extract_strided_slice %1 {offsets = [0, 0, 0], sizes = [4, 16, 16], strides = [1, 1, 1]} : vector<4x18x18xf32> to vector<4x16x16xf32>
    %3 = vector.shape_cast %2 : vector<4x16x16xf32> to vector<4x256xf32>
    %4 = vector.extract_strided_slice %1 {offsets = [0, 0, 1], sizes = [4, 16, 16], strides = [1, 1, 1]} : vector<4x18x18xf32> to vector<4x16x16xf32>
    %5 = vector.shape_cast %4 : vector<4x16x16xf32> to vector<4x256xf32>
    %6 = vector.extract_strided_slice %1 {offsets = [0, 0, 2], sizes = [4, 16, 16], strides = [1, 1, 1]} : vector<4x18x18xf32> to vector<4x16x16xf32>
    %7 = vector.shape_cast %6 : vector<4x16x16xf32> to vector<4x256xf32>
    %8 = vector.extract_strided_slice %1 {offsets = [0, 1, 0], sizes = [4, 16, 16], strides = [1, 1, 1]} : vector<4x18x18xf32> to vector<4x16x16xf32>
    %9 = vector.shape_cast %8 : vector<4x16x16xf32> to vector<4x256xf32>
    %10 = vector.extract_strided_slice %1 {offsets = [0, 1, 1], sizes = [4, 16, 16], strides = [1, 1, 1]} : vector<4x18x18xf32> to vector<4x16x16xf32>
    %11 = vector.shape_cast %10 : vector<4x16x16xf32> to vector<4x256xf32>
    %12 = vector.extract_strided_slice %1 {offsets = [0, 1, 2], sizes = [4, 16, 16], strides = [1, 1, 1]} : vector<4x18x18xf32> to vector<4x16x16xf32>
    %13 = vector.shape_cast %12 : vector<4x16x16xf32> to vector<4x256xf32>
    %14 = vector.extract_strided_slice %1 {offsets = [0, 2, 0], sizes = [4, 16, 16], strides = [1, 1, 1]} : vector<4x18x18xf32> to vector<4x16x16xf32>
    %15 = vector.shape_cast %14 : vector<4x16x16xf32> to vector<4x256xf32>
    %16 = vector.extract_strided_slice %1 {offsets = [0, 2, 1], sizes = [4, 16, 16], strides = [1, 1, 1]} : vector<4x18x18xf32> to vector<4x16x16xf32>
    %17 = vector.shape_cast %16 : vector<4x16x16xf32> to vector<4x256xf32>
    %18 = vector.extract_strided_slice %1 {offsets = [0, 2, 2], sizes = [4, 16, 16], strides = [1, 1, 1]} : vector<4x18x18xf32> to vector<4x16x16xf32>
    %19 = vector.shape_cast %18 : vector<4x16x16xf32> to vector<4x256xf32>
    %20 = tpu.concatenate %3, %5, %7, %9, %11, %13, %15, %17, %19 in 0 : vector<4x256xf32>, vector<4x256xf32>, vector<4x256xf32>, vector<4x256xf32>, vector<4x256xf32>, vector<4x256xf32>, vector<4x256xf32>, vector<4x256xf32>, vector<4x256xf32> -> vector<36x256xf32>
    %c0_3 = arith.constant 0 : index
    %c0_4 = arith.constant 0 : index
    %21 = vector.load %arg2[%c0_3, %c0_4] : memref<8x36xf32, #tpu.memory_space<vmem>>, vector<8x36xf32>
    %cst = arith.constant dense<0.000000e+00> : vector<8x256xf32>
    %22 = tpu.matmul %21, %20, %cst {dimension_numbers = #tpu.dot_dimension_numbers<[1], [0], [0], [1], [0, 0, 1, 1], [], []>} : vector<8x36xf32>, vector<36x256xf32>, vector<8x256xf32> -> vector<8x256xf32>
    %c0_5 = arith.constant 0 : index
    %c0_6 = arith.constant 0 : index
    %23 = vector.load %arg3[%c0_5, %c0_6] : memref<8x1xf32, #tpu.memory_space<vmem>>, vector<8x1xf32>
    %24 = vector.broadcast %23 : vector<8x1xf32> to vector<8x256xf32>
    %25 = arith.addf %22, %24 : vector<8x256xf32>
    %c0_7 = arith.constant 0 : index
    %c0_8 = arith.constant 0 : index
    %c0_9 = arith.constant 0 : index
    %26 = vector.load %arg4[%c0_7, %c0_8, %c0_9] : memref<1x8x256xf32, #tpu.memory_space<vmem>>, vector<1x8x256xf32>
    %27 = vector.shape_cast %26 : vector<1x8x256xf32> to vector<8x256xf32>
    %28 = vector.shape_cast %25 : vector<8x256xf32> to vector<1x8x256xf32>
    tpu.vector_store %arg4[%c0_7, %c0_8, %c0_9], %28 {strides = array<i32>} : memref<1x8x256xf32, #tpu.memory_space<vmem>>, vector<1x8x256xf32>,
    return
  }
  func.func @transform_0(%arg0: i32) -> (i32, i32, i32, i32) {
    %c0_i32 = arith.constant 0 : i32
    %c0_i32_0 = arith.constant 0 : i32
    %c0_i32_1 = arith.constant 0 : i32
    %c0_i32_2 = arith.constant 0 : i32
    return %arg0, %c0_i32, %c0_i32_0, %c0_i32_1 : i32, i32, i32, i32
  }
  func.func @transform_1(%arg0: i32) -> (i32, i32) {
    %c0_i32 = arith.constant 0 : i32
    %c0_i32_0 = arith.constant 0 : i32
    %c0_i32_1 = arith.constant 0 : i32
    return %c0_i32, %c0_i32_0 : i32, i32
  }
  func.func @transform_2(%arg0: i32) -> (i32, i32) {
    %c0_i32 = arith.constant 0 : i32
    %c0_i32_0 = arith.constant 0 : i32
    %c0_i32_1 = arith.constant 0 : i32
    return %c0_i32, %c0_i32_0 : i32, i32
  }
  func.func @transform_3(%arg0: i32) -> (i32, i32, i32) {
    %c0_i32 = arith.constant 0 : i32
    %c0_i32_0 = arith.constant 0 : i32
    %c0_i32_1 = arith.constant 0 : i32
    return %arg0, %c0_i32, %c0_i32_0 : i32, i32, i32
  }
}

</mosaic_0001>

<bundles_post_ra>
// kernel: tpu_custom_call.1
= control target key start
LH: loop header
LB: loop body
LE: loop exit
PB: predicated region body
PF: predicated region fallthrough
CT: control target
= control target key end

     0   :  { %8 = vsyncpa [#allocation3], 0  ;;  %s4172_s0 = inlined_call_operand.vmem [shape: f32[2,4,18,18], index: 0, kind: input, shape index: {}]   ;;  %s4173_s1 = inlined_call_operand.vmem [shape: f32[8,36], index: 1, kind: input, shape index: {}]   ;;  %s4174_s2 = inlined_call_operand.vmem [shape: f32[8,1], index: 2, kind: input, shape index: {}]   ;;  %s4175_s3 = inlined_call_operand.hbm [shape: f32[2,8,256], index: 3, kind: output, shape index: {}]  }
   0x1   :  { %10 = vsyncpa [#allocation3 + $0x1], 0  ;;  %s2760_s12 = smov 0   ;;  %s2762_s13 = smov 0  }
   0x2   :  { %s2764_s14 = smov 0   ;;  %s2766_s15 = smov 0  }
   0x3 LB: > { %s2781_s16 = sadd.s32 4294967295, %s2726_s15   ;;  %s2209_s17 = sadd.s32 4294967294, %s2726_s15   ;;  %s2726_s15 = sphi %s2766_s15, %s4211_s15   ;;  %s2722_s14 = sphi %s2764_s14, %s4210_s14   ;;  %s2718_s13 = sphi %s2762_s13, %s4209_s13   ;;  %s2714_s12 = sphi %s2760_s12, %s4208_s12  }
   0x4   : > { %s2785_s18 = sadd.s32 1, %s2726_s15   ;;  %s91_s19 = sadd.s32 1, %s2722_s14 }
   0x5   : > { %s88_s20 = ssub.s32 %s2726_s15, %s2785_s18  ;;  %p101_p0 = scmp.ne.s32.totalorder %s2722_s14, %s2718_s13 }
   0x6   : > { %p89_p1 = scmp.eq.s32.totalorder %s88_s20, 0  ;;  %p102_p2 = scmp.eq.s32.totalorder %s2781_s16, 1 }
   0x7   : > { %p107_p3 = scmp.ne.s32.totalorder %s2718_s13, %s2714_s12  ;;  %p108_p4 = scmp.eq.s32.totalorder %s2209_s17, 1 }
   0x8   : > { %s2796_s21 = scalar_select %p89_p1, %s2722_s14, %s91_s19  }
   0x9   : > { %p2798_p5 = por %p102_p2, %p101_p0  ;;  %p2802_p6 = por %p108_p4, %p107_p3 }
   0xa   : > { %p2212_p7 = scmp.ge.s32.totalorder %s2726_s15, 1  ;;  %p140_p8 = scmp.lt.s32.totalorder %s2726_s15, 3 }
   0xc   : > { %p141_p9 = pnand %p2212_p7, %p140_p8 }
   0xe   : > { %144 = sbr.rel (%p141_p9) target bundleno = 748 (0x2ec), region = 32 }
  0x13   : > { %p164_p10 = scmp.lt.s32.totalorder %s2781_s16, 1  ;;  %v2728_v0 = vmov 1983009808   ;;  %vm182_vm0 = vcmask 1047556   ;;  %v2729_v11 = vmov 1934713408  }
  0x14   : > { %v187_v1 = vunpack.c.l.s4 %v2728_v0  ;;  %v211_v12 = vunpack.c.l.s4 %v2729_v11  ;;  %s2730_s29 = smov 127   ;;  %s2731_s30 = smov 64   ;;  %vm795_vm1 = vcmask 1046528   ;;  %vm1418_vm2 = vcmask 1045504  }
  0x15   : > { %s165_s24 = scalar_select %p164_p10, %s2781_s16, 1  ;;  %vm350_vm3 = vcmask 130048   ;;  %vm352_vm4 = vcmask 261120   ;;  %vm354_vm5 = vcmask 392192   ;;  %vm356_vm6 = vcmask 523264  }
  0x16   : > { %v2838_v10 = vunpack.c.0.s8 %v187_v1  ;;  %v2869_v31 = vunpack.c.0.s8 %v211_v12  ;;  %s2732_s4 = smov 32   ;;  %s2733_s5 = smov 48   ;;  %vm358_vm7 = vcmask 654336   ;;  %vm360_vm8 = vcmask 785408  }
  0x17   : > { %s2225_s25 = smul.u32 96, %s165_s24  ;;  %s2734_s6 = smov 16   ;;  %vm362_vm9 = vcmask 916480   ;;  %vm2065_vm10 = vcmask 1043456   ;;  %vm2081_vm11 = vcmask 293888  }
  0x18   : > { %s2735_s7 = smov 96   ;;  %s2736_s8 = smov 112  }
  0x19   : > { %s2813_s28 = scalar_lea.vmem %s4172_s0, %s2225_s25  ;;  %s2737_s9 = smov 80  }
  0x1a   : > { %v2816_v2 = vld [vmem:[%s2813_s28] sm:$0xff]  ;;  %v2819_v3 = vld [vmem:[%s2813_s28 + $0x8] sm:$0xff]  ;;  %v2822_v4 = vld [vmem:[%s2813_s28 + $0x18] sm:$0xff]  ;;  %s2738_s10 = smov 126   ;;  %s161_s24 = sand.u32 1, %s2718_s13  }
  0x1b   : > { %v2826_v5 = vpack.i.bf16 %v2819_v3, %v2816_v2  ;;  %v2829_v6 = vld [vmem:[%s2813_s28 + $0x20] sm:$0xff]  ;;  %v2832_v7 = vld [vmem:[%s2813_s28 + $0x30] sm:$0xff]  ;;  %v2835_v8 = vld [vmem:[%s2813_s28 + $0x38] sm:$0xff]  ;;  %v184_v9 = vrot.slane %v2816_v2, 4  ;;  %v196_v15 = vrot.slane %v2822_v4, 4  ;;  %v240_v16 = vrot.slane %v2819_v3, 4 }
  0x1c   : > { %v2841_v13 = vld [vmem:[%s2813_s28 + $0x48] sm:$0xff]  ;;  %v2844_v14 = vld [vmem:[%s2813_s28 + $0x50] sm:$0xff]  ;;  %v252_v17 = vrot.slane %v2829_v6, 4  ;;  %v181_v18 = vrot.slane %v2832_v7, 4  ;;  %v238_v21 = vrot.slane %v2835_v8, 4  ;;  %s2213_s25 = sshll.u32 %s161_s24, 4 }
  0x1d   : > { %2278 = vrot.lane.b32.xlu1 %v2826_v5, %s2730_s29  ;;  %v185_v19 = vsel %vm182_vm0, %v2832_v7, %v184_v9  ;;  %v194_v20 = vrot.slane %v2841_v13, 4  ;;  %v250_v22 = vrot.slane %v2844_v14, 4  ;;  %v197_v24 = vsel %vm182_vm0, %v2841_v13, %v196_v15  ;;  %s2224_s26 = sshll.u32 %s2781_s16, 4 }
  0x1e   : > { %v193_v23 = vperm.slane %v185_v19, %v2838_v10  ;;  %v241_v25 = vsel %vm182_vm0, %v2835_v8, %v240_v16  ;;  %v253_v26 = vsel %vm182_vm0, %v2844_v14, %v252_v17  ;;  %v205_v27 = vperm.slane %v197_v24, %v2838_v10 }
  0x1f   : > { %v249_v28 = vperm.slane %v241_v25, %v2838_v10  ;;  %v261_v29 = vperm.slane %v253_v26, %v2838_v10  ;;  %v183_v30 = vsel %vm182_vm0, %v181_v18, %v2816_v2  ;;  %v195_v33 = vsel %vm182_vm0, %v194_v20, %v2822_v4  ;;  %v171_v20 = vld [vmem:[%s2813_s28 + $0x10] sm:$0x3] }
  0x20   : > { %v189_v32 = vperm.slane %v183_v30, %v2838_v10  ;;  %v239_v34 = vsel %vm182_vm0, %v238_v21, %v2819_v3  ;;  %v218_v35 = vrot.slane %v205_v27, 4  ;;  %v220_v36 = vrot.slane %v193_v23, 4 }
  0x21   : > { %v274_v37 = vrot.slane %v261_v29, 4  ;;  %v201_v38 = vperm.slane %v195_v33, %v2838_v10  ;;  %v276_v39 = vrot.slane %v249_v28, 4  ;;  %v245_v41 = vperm.slane %v239_v34, %v2838_v10  ;;  %v2931_v33 = vld [vmem:[%s2813_s28 + $0x40] sm:$0x3] }
  0x22   : > { %v208_v40 = vrot.slane %v189_v32, 4  ;;  %v251_v42 = vsel %vm182_vm0, %v250_v22, %v2829_v6  ;;  %v219_v43 = vsel %vm182_vm0, %v218_v35, %v193_v23  ;;  %v221_v54 = vsel %vm182_vm0, %v205_v27, %v220_v36 }
  0x23   : > { %v275_v44 = vsel %vm182_vm0, %v274_v37, %v249_v28  ;;  %v206_v45 = vrot.slane %v201_v38, 4  ;;  %v257_v46 = vperm.slane %v251_v42, %v2838_v10  ;;  %v225_v47 = vperm.slane %v219_v43, %v2869_v31  ;;  %v2926_v28 = vld [vmem:[%s2813_s28 + $0x28] sm:$0x3] }
  0x24   : > { %v2885_v48 = vperm.slane %v275_v44, %v2869_v31  ;;  %v209_v49 = vsel %vm182_vm0, %v201_v38, %v208_v40  ;;  %v264_v50 = vrot.slane %v245_v41, 4  ;;  %v229_v58 = vperm.slane %v221_v54, %v2869_v31 }
  0x25   : > { %v217_v51 = vperm.slane %v209_v49, %v2869_v31  ;;  %v262_v52 = vrot.slane %v257_v46, 4  ;;  %v207_v53 = vsel %vm182_vm0, %v206_v45, %v189_v32  ;;  %v277_v62 = vsel %vm182_vm0, %v261_v29, %v276_v39 }
  0x26   : > { %v2292_v55 = vpack.i.bf16 %v2885_v48, %v225_v47  ;;  %v265_v56 = vsel %vm182_vm0, %v257_v46, %v264_v50  ;;  %v2894_v57 = vperm.slane %v207_v53, %v2869_v31  ;;  %v285_v1 = vperm.slane %v277_v62, %v2869_v31 }
  0x27   : > { %v273_v59 = vperm.slane %v265_v56, %v2869_v31  ;;  %v232_v60 = vrot.slane %v217_v51, 4  ;;  %v263_v61 = vsel %vm182_vm0, %v262_v52, %v245_v41  ;;  %v2909_v15 = vpack.i.bf16 %v2829_v6, %v2822_v4 }
  0x28   : > { %2293 = vrot.lane.b32.xlu1 %v2292_v55, %s2731_s30  ;;  %v230_v63 = vrot.slane %v2894_v57, 4  ;;  %v2903_v0 = vperm.slane %v263_v61, %v2869_v31  ;;  %v236_v17 = vrot.slane %v229_v58, 4  ;;  %v292_v18 = vrot.slane %v285_v1, 4 }
  0x29   : > { %v288_v9 = vrot.slane %v273_v59, 4  ;;  %v2287_v11 = vpack.i.bf16 %v273_v59, %v217_v51  ;;  %v233_v12 = vsel %vm182_vm0, 0.0, %v232_v60  ;;  %2283 = vrot.lane.b32.xlu2 %v2909_v15, %s2730_s29  ;;  %v234_v24 = vrot.slane %v225_v47, 4 }
  0x2a   : > { %v286_v16 = vrot.slane %v2903_v0, 4  ;;  %v231_v22 = vsel %vm182_vm0, 0.0, %v230_v63  ;;  %v797_v25 = vrot.slane %v2819_v3, 1  ;;  %v796_v26 = vrot.slane %v2816_v2, 1  ;;  %v2935_v3 = vld [vmem:[%s2813_s28 + $0x58] sm:$0x3] }
  0x2b   : > { %2288 = vrot.lane.b32.xlu0 %v2287_v11, %s2732_s4  ;;  %v289_v19 = vsel %vm182_vm0, 0.0, %v288_v9  ;;  %v2923_v27 = vpack.i.bf16 %v2844_v14, %v2841_v13  ;;  %v237_v29 = vsel %vm182_vm0, 0.0, %v236_v17  ;;  %v293_v30 = vsel %vm182_vm0, 0.0, %v292_v18 }
  0x2c   : > { %v2307_v21 = vpack.i.bf16 %v289_v19, %v233_v12  ;;  %v287_v23 = vsel %vm182_vm0, 0.0, %v286_v16  ;;  %v2297_v32 = vpack.i.bf16 %v285_v1, %v229_v58  ;;  %v799_v34 = vrot.slane %v171_v20, 1 }
  0x2d   : > { %v2302_v35 = vpack.i.bf16 %v287_v23, %v231_v22  ;;  %v290_v36 = vrot.slane %v2885_v48, 4  ;;  %v801_v2 = vrot.slane %v2822_v4, 1  ;;  %v802_v37 = vrot.slane %v2829_v6, 1 }
  0x2e   : > { %v235_v38 = vsel %vm182_vm0, 0.0, %v234_v24  ;;  %v804_v39 = vrot.slane %v2926_v28, 1  ;;  %v806_v40 = vrot.slane %v2832_v7, 1  ;;  %v2944_v41 = vsel %vm795_vm1, %v796_v26, %v797_v25 }
  0x2f   : > { %v807_v42 = vrot.slane %v2835_v8, 1  ;;  %v809_v43 = vrot.slane %v2931_v33, 1  ;;  %v811_v44 = vrot.slane %v2841_v13, 1  ;;  %v2950_v45 = vsel %vm795_vm1, %v797_v25, %v799_v34 }
  0x30   : > { %2308 = vrot.lane.b32.xlu1 %v2307_v21, %s2733_s5  ;;  %v2953_v46 = vsel %vm795_vm1, %v801_v2, %v802_v37  ;;  %v812_v47 = vrot.slane %v2844_v14, 1  ;;  %v814_v48 = vrot.slane %v2935_v3, 1  ;;  %v291_v49 = vsel %vm182_vm0, 0.0, %v290_v36 }
  0x31   : > { %2298 = vrot.lane.b32.xlu2 %v2297_v32, %s2735_s7  ;;  %v2961_v50 = vsel %vm795_vm1, %v802_v37, %v804_v39  ;;  %v2964_v51 = vsel %vm795_vm1, %v806_v40, %v807_v42  ;;  %v2967_v52 = vsel %vm795_vm1, %v807_v42, %v809_v43  ;;  %v2317_v60 = vpack.i.bf16 %v293_v30, %v237_v29 }
  0x32   : > { %v2970_v53 = vsel %vm795_vm1, %v811_v44, %v812_v47  ;;  %v2973_v54 = vsel %vm795_vm1, %v812_v47, %v814_v48  ;;  %v824_v55 = vrot.slane %v2964_v51, 4  ;;  %v880_v56 = vrot.slane %v2967_v52, 4 }
  0x33   : > { %2303 = vrot.lane.b32.xlu0 %v2302_v35, %s2734_s6  ;;  %v836_v58 = vrot.slane %v2970_v53, 4  ;;  %v892_v59 = vrot.slane %v2973_v54, 4  ;;  %v2312_v61 = vpack.i.bf16 %v291_v49, %v235_v38  ;;  %v826_v18 = vrot.slane %v2944_v41, 4 }
  0x34   : > { %v825_v62 = vsel %vm182_vm0, %v824_v55, %v2944_v41  ;;  %v881_v63 = vsel %vm182_vm0, %v880_v56, %v2950_v45  ;;  %v838_v19 = vrot.slane %v2953_v46, 4  ;;  %v882_v22 = vrot.slane %v2950_v45, 4 }
  0x35   : > { %v831_v1 = vperm.slane %v825_v62, %v2838_v10  ;;  %v837_v9 = vsel %vm182_vm0, %v836_v58, %v2953_v46  ;;  %v887_v11 = vperm.slane %v881_v63, %v2838_v10  ;;  %v893_v12 = vsel %vm182_vm0, %v892_v59, %v2961_v50 }
  0x36   : > { %v843_v16 = vperm.slane %v837_v9, %v2838_v10  ;;  %v899_v17 = vperm.slane %v893_v12, %v2838_v10  ;;  %v894_v24 = vrot.slane %v2961_v50, 4  ;;  %v827_v30 = vsel %vm182_vm0, %v2964_v51, %v826_v18 }
  0x37   : > { %v850_v20 = vrot.slane %v831_v1, 4  ;;  %v906_v21 = vrot.slane %v887_v11, 4  ;;  %v883_v32 = vsel %vm182_vm0, %v2967_v52, %v882_v22  ;;  %v2322_v34 = vpack.i.bf16 %v2835_v8, %v2832_v7 }
  0x38   : > { %2328 = vrot.lane.b32.xlu1 %v2923_v27, %s2730_s29  ;;  %v839_v35 = vsel %vm182_vm0, %v2970_v53, %v838_v19  ;;  %v848_v36 = vrot.slane %v843_v16, 4  ;;  %v904_v2 = vrot.slane %v899_v17, 4  ;;  %v835_v39 = vperm.slane %v827_v30, %v2838_v10 }
  0x39   : > { %2313 = vrot.lane.b32.xlu2 %v2312_v61, %s2737_s9  ;;  %v851_v23 = vsel %vm182_vm0, %v843_v16, %v850_v20  ;;  %v907_v25 = vsel %vm182_vm0, %v899_v17, %v906_v21  ;;  %v891_v40 = vperm.slane %v883_v32, %v2838_v10  ;;  %v895_v42 = vsel %vm182_vm0, %v2973_v54, %v894_v24 }
  0x3a   : > { %v859_v26 = vperm.slane %v851_v23, %v2869_v31  ;;  %v915_v29 = vperm.slane %v907_v25, %v2869_v31  ;;  %v862_v43 = vrot.slane %v835_v39, 4  ;;  %v847_v47 = vperm.slane %v839_v35, %v2838_v10 }
  0x3b   : > { %2318 = vrot.lane.b32.xlu0 %v2317_v60, %s2736_s8  ;;  %v918_v44 = vrot.slane %v891_v40, 4  ;;  %v903_v48 = vperm.slane %v895_v42, %v2838_v10  ;;  %v849_v49 = vsel %vm182_vm0, %v848_v36, %v831_v1  ;;  %v905_v55 = vsel %vm182_vm0, %v904_v2, %v887_v11 }
  0x3c   : > { %v874_v37 = vrot.slane %v859_v26, 4  ;;  %v930_v38 = vrot.slane %v915_v29, 4  ;;  %v3029_v56 = vperm.slane %v905_v55, %v2869_v31  ;;  %v863_v59 = vsel %vm182_vm0, %v847_v47, %v862_v43 }
  0x3d   : > { %v919_v60 = vsel %vm182_vm0, %v903_v48, %v918_v44  ;;  %v860_v63 = vrot.slane %v847_v47, 4  ;;  %v916_v1 = vrot.slane %v903_v48, 4  ;;  %v871_v12 = vperm.slane %v863_v59, %v2869_v31 }
  0x3e   : > { %v875_v7 = vsel %vm182_vm0, 0.0, %v874_v37  ;;  %v931_v8 = vsel %vm182_vm0, 0.0, %v930_v38  ;;  %v928_v62 = vrot.slane %v3029_v56, 4  ;;  %v927_v16 = vperm.slane %v919_v60, %v2869_v31 }
  0x3f   : > { %v2362_v58 = vpack.i.bf16 %v931_v8, %v875_v7  ;;  %v861_v18 = vsel %vm182_vm0, %v860_v63, %v835_v39  ;;  %v917_v19 = vsel %vm182_vm0, %v916_v1, %v891_v40  ;;  %v878_v24 = vrot.slane %v871_v12, 4 }
  0x40   : > { %2338 = vrot.lane.b32.xlu1 %v2909_v15, %s2738_s10  ;;  %v3026_v15 = vperm.slane %v849_v49, %v2869_v31  ;;  %v929_v11 = vsel %vm182_vm0, 0.0, %v928_v62  ;;  %v2377_v20 = vpack.i.bf16 %v927_v16, %v871_v12  ;;  %v867_v21 = vperm.slane %v861_v18, %v2869_v31 }
  0x41   : > { %2343 = vrot.lane.b32.xlu2 %v2322_v34, %s2738_s10  ;;  %v923_v22 = vperm.slane %v917_v19, %v2869_v31  ;;  %v934_v25 = vrot.slane %v927_v16, 4  ;;  %v879_v30 = vsel %vm182_vm0, 0.0, %v878_v24  ;;  %v3062_v39 = vpack.i.bf16 %v2967_v52, %v2964_v51 }
  0x42   : > { %v872_v61 = vrot.slane %v3026_v15, 4  ;;  %v876_v36 = vrot.slane %v867_v21, 4  ;;  %v1434_v51 = vrot.slane %v2841_v13, 2  ;;  %v1435_v52 = vrot.slane %v2844_v14, 2 }
  0x43   : > { %2323 = vrot.lane.b32.xlu0 %v2322_v34, %s2730_s29  ;;  %v2367_v23 = vpack.i.bf16 %v923_v22, %v867_v21  ;;  %v935_v32 = vsel %vm182_vm0, 0.0, %v934_v25  ;;  %v2357_v34 = vpack.i.bf16 %v915_v29, %v859_v26  ;;  %v932_v2 = vrot.slane %v923_v22, 4 }
  0x44   : > { %v873_v9 = vsel %vm182_vm0, 0.0, %v872_v61  ;;  %v2382_v35 = vpack.i.bf16 %v935_v32, %v879_v30  ;;  %v2387_v26 = vpack.i.bf16 %v2950_v45, %v2944_v41  ;;  %v2402_v29 = vpack.i.bf16 %v2973_v54, %v2970_v53 }
  0x45   : > { %v2352_v17 = vpack.i.bf16 %v929_v11, %v873_v9  ;;  %v933_v37 = vsel %vm182_vm0, 0.0, %v932_v2  ;;  %v1437_v42 = vrot.slane %v2935_v3, 2  ;;  %v3080_v41 = vsel %vm1418_vm2, %v1434_v51, %v1435_v52 }
  0x46   : > { %v1424_v13 = vrot.slane %v2822_v4, 2  ;;  %v1425_v14 = vrot.slane %v2829_v6, 2  ;;  %v2412_v3 = vpack.i.bf16 %v2970_v53, %v2953_v46  ;;  %v1427_v43 = vrot.slane %v2926_v28, 2 }
  0x47   : > { %v3083_v45 = vsel %vm1418_vm2, %v1435_v52, %v1437_v42  ;;  %v2422_v6 = vpack.i.bf16 %v2961_v50, %v2973_v54 }
  0x48   : > { %2363 = vrot.lane.b32.xlu1 %v2362_v58, %s2733_s5  ;;  %v2417_v8 = vpack.i.bf16 %v3083_v45, %v3080_v41  ;;  %v3098_v44 = vsel %vm1418_vm2, %v1424_v13, %v1425_v14  ;;  %v3102_v47 = vsel %vm1418_vm2, %v1425_v14, %v1427_v43 }
  0x49   : > { %2353 = vrot.lane.b32.xlu2 %v2352_v17, %s2734_s6  ;;  %v2427_v4 = vpack.i.bf16 %v3102_v47, %v3098_v44 }
  0x4b   : > { %2333 = vrot.lane.b32.xlu0 %v2826_v5, %s2738_s10  ;;  %v2392_v5 = vpack.i.bf16 %v2961_v50, %v2953_v46 }
  0x50   : > { %2378 = vrot.lane.b32.xlu1 %v2377_v20, %s2735_s7 }
  0x51   : > { %2368 = vrot.lane.b32.xlu2 %v2367_v23, %s2731_s30 }
  0x53   : > { %2348 = vrot.lane.b32.xlu0 %v2923_v27, %s2738_s10  ;;  %v877_v27 = vsel %vm182_vm0, 0.0, %v876_v36 }
  0x54   : > { %v2372_v38 = vpack.i.bf16 %v933_v37, %v877_v27 }
  0x58   : > { %2393 = vrot.lane.b32.xlu1 %v2392_v5, %s2730_s29 }
  0x59   : > { %2383 = vrot.lane.b32.xlu2 %v2382_v35, %s2736_s8 }
  0x5b   : > { %2358 = vrot.lane.b32.xlu0 %v2357_v34, %s2732_s4 }
  0x60   : > { %2418 = vrot.lane.b32.xlu1 %v2417_v8, %s2730_s29 }
  0x61   : > { %2398 = vrot.lane.b32.xlu2 %v3062_v39, %s2730_s29 }
  0x63   : > { %2373 = vrot.lane.b32.xlu0 %v2372_v38, %s2737_s9 }
  0x68   : > { %2423 = vrot.lane.b32.xlu1 %v2422_v6, %s2738_s10 }
  0x69   : > { %2408 = vrot.lane.b32.xlu2 %v2387_v26, %s2738_s10 }
  0x6b   : > { %2388 = vrot.lane.b32.xlu0 %v2387_v26, %s2730_s29 }
  0x71   : > { %1847 = vrot.lane.b32.xlu2 %v3080_v41, %s2738_s10 }
  0x73   : > { %2403 = vrot.lane.b32.xlu0 %v2402_v29, %s2730_s29 }
  0x79   : > { %2428 = vrot.lane.b32.xlu2 %v2427_v4, %s2730_s29 }
  0x7b   : > { %2413 = vrot.lane.b32.xlu0 %v2412_v3, %s2738_s10 }
  0x83   : > { %v3074_v40 = vpop.permute.xlu2 %2283  ;;  %1849 = vrot.lane.b32.xlu0 %v3083_v45, %s2738_s10 }
  0x84   : > { %v2286_v17 = vunpack.i.h.bf16 %v3074_v40 }
  0x86   : > { %v473_v5 = vrot.slane %v2286_v17, 4 }
  0x8b   : > { %v2299_v48 = vpop.permute.xlu2 %2298 }
  0x8c   : > { %v2301_v30 = vunpack.i.h.bf16 %v2299_v48  ;;  %v2300_v32 = vunpack.i.l.bf16 %v2299_v48 }
  0x8f   : > { %v3085_v7 = vpop.permute.xlu1 %2278 }
  0x90   : > { %v2281_v38 = vunpack.i.h.bf16 %v3085_v7  ;;  %v2280_v26 = vunpack.i.l.bf16 %v3085_v7 }
  0x92   : > { %v461_v4 = vrot.slane %v2281_v38, 4  ;;  %v405_v6 = vrot.slane %v2280_v26, 4 }
  0x93   : > { %v2314_v53 = vpop.permute.xlu2 %2313 }
  0x94   : > { %v2316_v11 = vunpack.i.h.bf16 %v2314_v53  ;;  %v2315_v12 = vunpack.i.l.bf16 %v2314_v53 }
  0x9a   : > { %v2294_v46 = vpop.permute.xlu1 %2293 }
  0x9b   : > { %v2296_v62 = vunpack.i.h.bf16 %v2294_v46  ;;  %v2295_v50 = vunpack.i.l.bf16 %v2294_v46  ;;  %v3116_v16 = vpop.permute.xlu2 %2343 }
  0x9c   : > { %v2346_v29 = vunpack.i.h.bf16 %v3116_v16  ;;  %v2345_v43 = vunpack.i.l.bf16 %v3116_v16 }
  0x9d   : > { %v2289_v28 = vpop.permute.xlu0 %2288 }
  0x9e   : > { %v2291_v54 = vunpack.i.h.bf16 %v2289_v28  ;;  %v2290_v63 = vunpack.i.l.bf16 %v2289_v28  ;;  %v665_v53 = vrot.slane %v2346_v29, 4 }
  0xa2   : > { %v2309_v49 = vpop.permute.xlu1 %2308 }
  0xa3   : > { %v2311_v58 = vunpack.i.h.bf16 %v2309_v49  ;;  %v2310_v59 = vunpack.i.l.bf16 %v2309_v49  ;;  %v3134_v8 = vpop.permute.xlu2 %2353 }
  0xa4   : > { %v2356_v48 = vunpack.i.h.bf16 %v3134_v8 }
  0xa5   : > { %v2304_v55 = vpop.permute.xlu0 %2303 }
  0xa6   : > { %v2306_v60 = vunpack.i.h.bf16 %v2304_v55  ;;  %v2305_v61 = vunpack.i.l.bf16 %v2304_v55 }
  0xa8   : > { %v364_v1 = vsel %vm350_vm3, %v2903_v0, %v2306_v60  ;;  %v351_v9 = vsel %vm350_vm3, %v2894_v57, %v2305_v61  ;;  %v2285_v0 = vunpack.i.l.bf16 %v3074_v40  ;;  %v609_v61 = vrot.slane %v2345_v43, 4 }
  0xa9   : > { %v365_v18 = vsel %vm352_vm4, %v364_v1, %v2291_v54  ;;  %v353_v19 = vsel %vm352_vm4, %v351_v9, %v2290_v63 }
  0xaa   : > { %v355_v20 = vsel %vm354_vm5, %v353_v19, %v2310_v59  ;;  %v366_v21 = vsel %vm354_vm5, %v365_v18, %v2311_v58  ;;  %v2329_v23 = vpop.permute.xlu1 %2328  ;;  %v417_v27 = vrot.slane %v2285_v0, 4 }
  0xab   : > { %v357_v22 = vsel %vm356_vm6, %v355_v20, %v2295_v50  ;;  %v367_v57 = vsel %vm356_vm6, %v366_v21, %v2296_v62  ;;  %v2331_v35 = vunpack.i.h.bf16 %v2329_v23  ;;  %v2330_v37 = vunpack.i.l.bf16 %v2329_v23 }
  0xac   : > { %v359_v24 = vsel %vm358_vm7, %v357_v22, %v2315_v12  ;;  %v368_v25 = vsel %vm358_vm7, %v367_v57, %v2316_v11  ;;  %v3153_v62 = vsel %vm350_vm3, %v3029_v56, %v2356_v48  ;;  %v2355_v50 = vunpack.i.l.bf16 %v3134_v8 }
  0xad   : > { %v2319_v34 = vpop.permute.xlu0 %2318  ;;  %v361_v40 = vsel %vm360_vm8, %v359_v24, %v2300_v32  ;;  %v369_v51 = vsel %vm360_vm8, %v368_v25, %v2301_v30  ;;  %v471_v52 = vrot.slane %v2331_v35, 4  ;;  %v474_v42 = vsel %vm182_vm0, %v2331_v35, %v473_v5 }
  0xae   : > { %v2321_v36 = vunpack.i.h.bf16 %v2319_v34  ;;  %v2320_v2 = vunpack.i.l.bf16 %v2319_v34  ;;  %v415_v3 = vrot.slane %v2330_v37, 4  ;;  %v418_v7 = vsel %vm182_vm0, %v2330_v37, %v417_v27 }
  0xaf   : > { %v482_v46 = vperm.slane %v474_v42, %v2838_v10  ;;  %v472_v49 = vsel %vm182_vm0, %v471_v52, %v2286_v17  ;;  %v426_v55 = vperm.slane %v418_v7, %v2838_v10 }
  0xb0   : > { %v3137_v13 = vsel %vm362_vm9, %v361_v40, %v2320_v2  ;;  %v3140_v14 = vsel %vm362_vm9, %v369_v51, %v2321_v36  ;;  %v416_v60 = vsel %vm182_vm0, %v415_v3, %v2285_v0  ;;  %v3159_v11 = vperm.slane %v472_v49, %v2838_v10 }
  0xb1   : > { %v495_v12 = vrot.slane %v482_v46, 4  ;;  %v3166_v56 = vperm.slane %v416_v60, %v2838_v10  ;;  %v439_v20 = vrot.slane %v426_v55, 4  ;;  %v3212_v49 = vsel %vm350_vm3, %v3026_v15, %v2355_v50 }
  0xb2   : > { %v3163_v19 = vpop.permute.xlu1 %2338 }
  0xb3   : > { %v2341_v30 = vunpack.i.h.bf16 %v3163_v19  ;;  %v2340_v32 = vunpack.i.l.bf16 %v3163_v19 }
  0xb5   : > { %v2324_v28 = vpop.permute.xlu0 %2323 }
  0xb6   : > { %v2326_v58 = vunpack.i.h.bf16 %v2324_v28  ;;  %v2325_v59 = vunpack.i.l.bf16 %v2324_v28 }
  0xb8   : > { %v459_v54 = vrot.slane %v2326_v58, 4  ;;  %v462_v63 = vsel %vm182_vm0, %v2326_v58, %v461_v4  ;;  %v403_v1 = vrot.slane %v2325_v59, 4  ;;  %v406_v9 = vsel %vm182_vm0, %v2325_v59, %v405_v6  ;;  %v3202_v6 = vpop.permute.xlu2 %2368 }
  0xb9   : > { %v470_v17 = vperm.slane %v462_v63, %v2838_v10  ;;  %v414_v18 = vperm.slane %v406_v9, %v2838_v10  ;;  %v2370_v16 = vunpack.i.l.bf16 %v3202_v6  ;;  %v623_v63 = vrot.slane %v2340_v32, 4 }
  0xba   : > { %v460_v21 = vsel %vm182_vm0, %v459_v54, %v2281_v38  ;;  %v404_v0 = vsel %vm182_vm0, %v403_v1, %v2280_v26  ;;  %v427_v9 = vrot.slane %v3166_v56, 4 }
  0xbb   : > { %v3171_v22 = vperm.slane %v460_v21, %v2838_v10  ;;  %v497_v57 = vrot.slane %v470_v17, 4  ;;  %v3174_v23 = vperm.slane %v404_v0, %v2838_v10  ;;  %v441_v24 = vrot.slane %v414_v18, 4 }
  0xbc   : > { %v440_v25 = vsel %vm182_vm0, %v439_v20, %v414_v18  ;;  %v496_v5 = vsel %vm182_vm0, %v495_v12, %v470_v17 }
  0xbd   : > { %v485_v34 = vrot.slane %v3171_v22, 4  ;;  %v429_v35 = vrot.slane %v3174_v23, 4  ;;  %v2334_v36 = vpop.permute.xlu0 %2333  ;;  %v3183_v2 = vperm.slane %v440_v25, %v2869_v31  ;;  %v3186_v27 = vperm.slane %v496_v5, %v2869_v31 }
  0xbe   : > { %v2336_v37 = vunpack.i.h.bf16 %v2334_v36  ;;  %v2335_v38 = vunpack.i.l.bf16 %v2334_v36  ;;  %v442_v26 = vsel %vm182_vm0, %v426_v55, %v441_v24  ;;  %v498_v40 = vsel %vm182_vm0, %v482_v46, %v497_v57 }
  0xbf   : > { %v2437_v51 = vpack.i.bf16 %v3186_v27, %v3183_v2  ;;  %v3193_v52 = vperm.slane %v442_v26, %v2869_v31  ;;  %v3196_v42 = vperm.slane %v498_v40, %v2869_v31  ;;  %v430_v8 = vsel %vm182_vm0, %v3166_v56, %v429_v35 }
  0xc0   : > { %v666_v3 = vsel %vm182_vm0, %v665_v53, %v2336_v37  ;;  %v667_v7 = vrot.slane %v2336_v37, 4  ;;  %v610_v48 = vsel %vm182_vm0, %v609_v61, %v2335_v38  ;;  %v611_v4 = vrot.slane %v2335_v38, 4  ;;  %v3224_v61 = vpop.permute.xlu1 %2363 }
  0xc1   : > { %v3205_v46 = vperm.slane %v666_v3, %v2838_v10  ;;  %2438 = vrot.lane.b32.xlu2 %v2437_v51, %s2731_s30  ;;  %v2442_v28 = vpack.i.bf16 %v3196_v42, %v3193_v52  ;;  %v2371_v53 = vunpack.i.h.bf16 %v3202_v6  ;;  %v3220_v59 = vperm.slane %v430_v8, %v2869_v31 }
  0xc2   : > { %v668_v55 = vsel %vm182_vm0, %v2346_v29, %v667_v7  ;;  %v612_v58 = vsel %vm182_vm0, %v2345_v43, %v611_v4  ;;  %v486_v60 = vsel %vm182_vm0, %v3159_v11, %v485_v34  ;;  %v3228_v15 = vperm.slane %v610_v48, %v2838_v10 }
  0xc3   : > { %v676_v54 = vperm.slane %v668_v55, %v2838_v10  ;;  %v620_v50 = vperm.slane %v612_v58, %v2838_v10  ;;  %2443 = vrot.lane.b32.xlu1 %v2442_v28, %s2735_s7  ;;  %v483_v29 = vrot.slane %v3159_v11, 4  ;;  %v679_v43 = vrot.slane %v2341_v30, 4  ;;  %v3263_v55 = vpop.permute.xlu2 %2383 }
  0xc4   : > { %v3235_v1 = vperm.slane %v486_v60, %v2869_v31  ;;  %v2366_v17 = vunpack.i.h.bf16 %v3224_v61  ;;  %v2365_v18 = vunpack.i.l.bf16 %v3224_v61  ;;  %v455_v19 = vrot.slane %v3183_v2, 4 }
  0xc5   : > { %v2349_v12 = vpop.permute.xlu0 %2348  ;;  %v691_v20 = vrot.slane %v3205_v46, 4  ;;  %v703_v57 = vrot.slane %v676_v54, 4  ;;  %v635_v24 = vrot.slane %v3228_v15, 4  ;;  %v647_v25 = vrot.slane %v620_v50, 4 }
  0xc6   : > { %v2432_v21 = vpack.i.bf16 %v3235_v1, %v3220_v59  ;;  %v2351_v11 = vunpack.i.h.bf16 %v2349_v12  ;;  %v2350_v0 = vunpack.i.l.bf16 %v2349_v12  ;;  %v511_v56 = vrot.slane %v3186_v27, 4 }
  0xc7   : > { %v428_v38 = vsel %vm182_vm0, %v427_v9, %v3174_v23  ;;  %v484_v26 = vsel %vm182_vm0, %v483_v29, %v3171_v22  ;;  %v453_v51 = vrot.slane %v3220_v59, 4  ;;  %v509_v8 = vrot.slane %v3235_v1, 4 }
  0xc8   : > { %2433 = vrot.lane.b32.xlu0 %v2432_v21, %s2732_s4  ;;  %v677_v5 = vrot.slane %v2351_v11, 4  ;;  %v680_v34 = vsel %vm182_vm0, %v2351_v11, %v679_v43  ;;  %v621_v35 = vrot.slane %v2350_v0, 4  ;;  %v624_v36 = vsel %vm182_vm0, %v2350_v0, %v623_v63 }
  0xc9   : > { %v688_v2 = vperm.slane %v680_v34, %v2838_v10  ;;  %v632_v37 = vperm.slane %v624_v36, %v2838_v10  ;;  %v3266_v22 = vperm.slane %v428_v38, %v2869_v31  ;;  %v454_v36 = vsel %vm182_vm0, 0.0, %v453_v51 }
  0xca   : > { %v678_v27 = vsel %vm182_vm0, %v677_v5, %v2341_v30  ;;  %v622_v40 = vsel %vm182_vm0, %v621_v35, %v2340_v32  ;;  %v3269_v30 = vperm.slane %v484_v26, %v2869_v31  ;;  %v512_v35 = vsel %vm182_vm0, 0.0, %v511_v56 }
  0xcb   : > { %v684_v3 = vperm.slane %v678_v27, %v2838_v10  ;;  %v701_v7 = vrot.slane %v688_v2, 4  ;;  %v628_v48 = vperm.slane %v622_v40, %v2838_v10  ;;  %v645_v4 = vrot.slane %v632_v37, 4  ;;  %v2399_v51 = vpop.permute.xlu2 %2398 }
  0xcc   : > { %v648_v28 = vsel %vm182_vm0, %v632_v37, %v647_v25  ;;  %v704_v23 = vsel %vm182_vm0, %v688_v2, %v703_v57  ;;  %v510_v2 = vsel %vm182_vm0, 0.0, %v509_v8  ;;  %v451_v37 = vrot.slane %v3266_v22, 4 }
  0xcd   : > { %v689_v32 = vrot.slane %v684_v3, 4  ;;  %v633_v58 = vrot.slane %v628_v48, 4  ;;  %v2359_v59 = vpop.permute.xlu0 %2358  ;;  %v3272_v60 = vperm.slane %v648_v28, %v2869_v31  ;;  %v3275_v61 = vperm.slane %v704_v23, %v2869_v31 }
  0xce   : > { %v2361_v29 = vunpack.i.h.bf16 %v2359_v59  ;;  %v2360_v43 = vunpack.i.l.bf16 %v2359_v59  ;;  %v646_v63 = vsel %vm182_vm0, %v645_v4, %v620_v50  ;;  %v702_v1 = vsel %vm182_vm0, %v701_v7, %v676_v54 }
  0xcf   : > { %v2457_v9 = vpack.i.bf16 %v3275_v61, %v3272_v60  ;;  %v3282_v12 = vperm.slane %v646_v63, %v2869_v31  ;;  %v3285_v21 = vperm.slane %v702_v1, %v2869_v31  ;;  %v636_v11 = vsel %vm182_vm0, %v628_v48, %v635_v24 }
  0xd0   : > { %v1000_v0 = vsel %vm352_vm4, %v3153_v62, %v2361_v29  ;;  %v993_v57 = vsel %vm352_vm4, %v3212_v49, %v2360_v43  ;;  %v644_v50 = vperm.slane %v636_v11, %v2869_v31  ;;  %v692_v54 = vsel %vm182_vm0, %v684_v3, %v691_v20  ;;  %v2379_v20 = vpop.permute.xlu1 %2378 }
  0xd1   : > { %v994_v25 = vsel %vm354_vm5, %v993_v57, %v2365_v18  ;;  %v1001_v5 = vsel %vm354_vm5, %v1000_v0, %v2366_v17  ;;  %2458 = vrot.lane.b32.xlu0 %v2457_v9, %s2735_s7  ;;  %v2452_v34 = vpack.i.bf16 %v3285_v21, %v3282_v12  ;;  %v700_v24 = vperm.slane %v692_v54, %v2869_v31 }
  0xd2   : > { %v995_v62 = vsel %vm356_vm6, %v994_v25, %v2370_v16  ;;  %v1002_v49 = vsel %vm356_vm6, %v1001_v5, %v2371_v53  ;;  %v456_v18 = vsel %vm182_vm0, 0.0, %v455_v19  ;;  %v507_v16 = vrot.slane %v3269_v30, 4 }
  0xd3   : > { %2453 = vrot.lane.b32.xlu1 %v2452_v34, %s2731_s30  ;;  %v2447_v17 = vpack.i.bf16 %v700_v24, %v644_v50  ;;  %v634_v6 = vsel %vm182_vm0, %v633_v58, %v3228_v15  ;;  %v690_v53 = vsel %vm182_vm0, %v689_v32, %v3205_v46  ;;  %v2381_v38 = vunpack.i.h.bf16 %v2379_v20 }
  0xd4   : > { %v2380_v26 = vunpack.i.l.bf16 %v2379_v20  ;;  %v659_v56 = vrot.slane %v644_v50, 4  ;;  %v715_v8 = vrot.slane %v700_v24, 4  ;;  %v3319_v3 = vperm.slane %v634_v6, %v2869_v31 }
  0xd5   : > { %2448 = vrot.lane.b32.xlu2 %v2447_v17, %s2732_s4  ;;  %v2374_v19 = vpop.permute.xlu0 %2373  ;;  %v2472_v7 = vpack.i.bf16 %v512_v35, %v456_v18  ;;  %v2467_v48 = vpack.i.bf16 %v510_v2, %v454_v36  ;;  %v3322_v15 = vperm.slane %v690_v53, %v2869_v31  ;;  %v452_v28 = vsel %vm182_vm0, 0.0, %v451_v37 }
  0xd6   : > { %v2376_v27 = vunpack.i.h.bf16 %v2374_v19  ;;  %v2375_v40 = vunpack.i.l.bf16 %v2374_v19  ;;  %v508_v23 = vsel %vm182_vm0, 0.0, %v507_v16  ;;  %v2401_v59 = vunpack.i.h.bf16 %v2399_v51 }
  0xd7   : > { %v2400_v29 = vunpack.i.l.bf16 %v2399_v51  ;;  %v660_v43 = vsel %vm182_vm0, 0.0, %v659_v56  ;;  %v716_v63 = vsel %vm182_vm0, 0.0, %v715_v8  ;;  %v657_v1 = vrot.slane %v3319_v3, 4 }
  0xd8   : > { %v996_v46 = vsel %vm358_vm7, %v995_v62, %v2375_v40  ;;  %v1003_v4 = vsel %vm358_vm7, %v1002_v49, %v2376_v27  ;;  %v713_v9 = vrot.slane %v3322_v15, 4  ;;  %v2385_v11 = vunpack.i.l.bf16 %v3263_v55  ;;  %v2394_v54 = vpop.permute.xlu1 %2393 }
  0xd9   : > { %v997_v32 = vsel %vm360_vm8, %v996_v46, %v2380_v26  ;;  %v1004_v58 = vsel %vm360_vm8, %v1003_v4, %v2381_v38  ;;  %2473 = vrot.lane.b32.xlu0 %v2472_v7, %s2737_s9  ;;  %v2462_v0 = vpack.i.bf16 %v508_v23, %v452_v28  ;;  %v457_v57 = vrot.slane %v3193_v52, 4 }
  0xda   : > { %v513_v50 = vrot.slane %v3196_v42, 4  ;;  %v2386_v25 = vunpack.i.h.bf16 %v3263_v55  ;;  %v1086_v5 = vrot.slane %v2401_v59, 4  ;;  %v1030_v34 = vrot.slane %v2400_v29, 4 }
  0xdb   : > { %2468 = vrot.lane.b32.xlu1 %v2467_v48, %s2733_s5  ;;  %v2487_v62 = vpack.i.bf16 %v716_v63, %v660_v43  ;;  %v658_v18 = vsel %vm182_vm0, 0.0, %v657_v1  ;;  %v714_v17 = vsel %vm182_vm0, 0.0, %v713_v9  ;;  %v458_v35 = vsel %vm182_vm0, 0.0, %v457_v57 }
  0xdc   : > { %v514_v52 = vsel %vm182_vm0, 0.0, %v513_v50  ;;  %v2396_v42 = vunpack.i.h.bf16 %v2394_v54  ;;  %v3346_v36 = vsel %vm362_vm9, %v997_v32, %v2385_v11  ;;  %v2395_v37 = vunpack.i.l.bf16 %v2394_v54 }
  0xdd   : > { %2463 = vrot.lane.b32.xlu2 %v2462_v0, %s2734_s6  ;;  %v2389_v24 = vpop.permute.xlu0 %2388  ;;  %v663_v16 = vrot.slane %v3272_v60, 4  ;;  %v2482_v6 = vpack.i.bf16 %v714_v17, %v658_v18  ;;  %v719_v53 = vrot.slane %v3275_v61, 4  ;;  %v661_v19 = vrot.slane %v3282_v12, 4 }
  0xde   : > { %v2391_v49 = vunpack.i.h.bf16 %v2389_v24  ;;  %v2390_v20 = vunpack.i.l.bf16 %v2389_v24  ;;  %v717_v38 = vrot.slane %v3285_v21, 4  ;;  %v2477_v27 = vpack.i.bf16 %v514_v52, %v458_v35 }
  0xdf   : > { %v1100_v40 = vrot.slane %v2396_v42, 4  ;;  %v1044_v8 = vrot.slane %v2395_v37, 4  ;;  %v664_v7 = vsel %vm182_vm0, 0.0, %v663_v16  ;;  %v720_v12 = vsel %vm182_vm0, 0.0, %v719_v53 }
  0xe0   : > { %v1088_v55 = vrot.slane %v2391_v49, 4  ;;  %v1032_v2 = vrot.slane %v2390_v20, 4  ;;  %v1087_v51 = vsel %vm182_vm0, %v1086_v5, %v2391_v49  ;;  %v1031_v60 = vsel %vm182_vm0, %v1030_v34, %v2390_v20  ;;  %v3376_v34 = vpop.permute.xlu2 %2408 }
  0xe1   : > { %2488 = vrot.lane.b32.xlu0 %v2487_v62, %s2733_s5  ;;  %v662_v21 = vsel %vm182_vm0, 0.0, %v661_v19  ;;  %v718_v48 = vsel %vm182_vm0, 0.0, %v717_v38  ;;  %v3364_v46 = vsel %vm362_vm9, %v1004_v58, %v2386_v25  ;;  %v2497_v0 = vpack.i.bf16 %v720_v12, %v664_v7 }
  0xe2   : > { %v1089_v26 = vsel %vm182_vm0, %v2401_v59, %v1088_v55  ;;  %v1033_v56 = vsel %vm182_vm0, %v2400_v29, %v1032_v2  ;;  %v1093_v59 = vperm.slane %v1087_v51, %v2838_v10  ;;  %v1037_v29 = vperm.slane %v1031_v60, %v2838_v10 }
  0xe3   : > { %2483 = vrot.lane.b32.xlu1 %v2482_v6, %s2734_s6  ;;  %v1097_v4 = vperm.slane %v1089_v26, %v2838_v10  ;;  %v1041_v28 = vperm.slane %v1033_v56, %v2838_v10  ;;  %v2492_v57 = vpack.i.bf16 %v718_v48, %v662_v21 }
  0xe4   : > { %v1112_v18 = vrot.slane %v1093_v59, 4  ;;  %v1056_v17 = vrot.slane %v1037_v29, 4 }
  0xe5   : > { %2478 = vrot.lane.b32.xlu2 %v2477_v27, %s2736_s8  ;;  %v2404_v61 = vpop.permute.xlu0 %2403  ;;  %v1124_v50 = vrot.slane %v1097_v4, 4  ;;  %v1068_v54 = vrot.slane %v1041_v28, 4 }
  0xe6   : > { %v2406_v23 = vunpack.i.h.bf16 %v2404_v61  ;;  %v2405_v32 = vunpack.i.l.bf16 %v2404_v61 }
  0xe8   : > { %v1098_v43 = vrot.slane %v2406_v23, 4  ;;  %v1101_v63 = vsel %vm182_vm0, %v2406_v23, %v1100_v40  ;;  %v1042_v1 = vrot.slane %v2405_v32, 4  ;;  %v1045_v9 = vsel %vm182_vm0, %v2405_v32, %v1044_v8 }
  0xe9   : > { %v1109_v11 = vperm.slane %v1101_v63, %v2838_v10  ;;  %v1053_v58 = vperm.slane %v1045_v9, %v2838_v10  ;;  %v2659_v63 = vld [vmem:[%s2813_s28 + $0x30] sm:$0xff] }
  0xea   : > { %v1099_v25 = vsel %vm182_vm0, %v1098_v43, %v2396_v42  ;;  %v1043_v5 = vsel %vm182_vm0, %v1042_v1, %v2395_v37  ;;  %v3408_v43 = vpop.permute.xlu2 %1847  ;;  %v1429_v1 = vrot.slane %v2659_v63, 2 }
  0xeb   : > { %v1105_v24 = vperm.slane %v1099_v25, %v2838_v10  ;;  %v1122_v62 = vrot.slane %v1109_v11, 4  ;;  %v1049_v49 = vperm.slane %v1043_v5, %v2838_v10  ;;  %v1066_v20 = vrot.slane %v1053_v58, 4  ;;  %2498 = vrot.lane.b32.xlu1 %v2497_v0, %s2736_s8 }
  0xec   : > { %v1069_v35 = vsel %vm182_vm0, %v1053_v58, %v1068_v54  ;;  %v1125_v52 = vsel %vm182_vm0, %v1109_v11, %v1124_v50  ;;  %v2660_v58 = vld [vmem:[%s2813_s28 + $0x38] sm:$0xff] }
  0xed   : > { %v1110_v55 = vrot.slane %v1105_v24, 4  ;;  %v1054_v42 = vrot.slane %v1049_v49, 4  ;;  %2493 = vrot.lane.b32.xlu2 %v2492_v57, %s2737_s9  ;;  %v1077_v2 = vperm.slane %v1069_v35, %v2869_v31  ;;  %v1133_v37 = vperm.slane %v1125_v52, %v2869_v31 }
  0xee   : > { %v1067_v16 = vsel %vm182_vm0, %v1066_v20, %v1041_v28  ;;  %v1123_v6 = vsel %vm182_vm0, %v1122_v62, %v1097_v4  ;;  %v1057_v53 = vsel %vm182_vm0, %v1049_v49, %v1056_v17  ;;  %v1113_v19 = vsel %vm182_vm0, %v1105_v24, %v1112_v18 }
  0xef   : > { %v2512_v38 = vpack.i.bf16 %v1133_v37, %v1077_v2  ;;  %v1073_v26 = vperm.slane %v1067_v16, %v2869_v31  ;;  %v1129_v56 = vperm.slane %v1123_v6, %v2869_v31  ;;  %v1065_v27 = vperm.slane %v1057_v53, %v2869_v31  ;;  %v2419_v6 = vpop.permute.xlu1 %2418 }
  0xf0   : > { %v1121_v40 = vperm.slane %v1113_v19, %v2869_v31  ;;  %v1055_v51 = vsel %vm182_vm0, %v1054_v42, %v1037_v29  ;;  %v1111_v60 = vsel %vm182_vm0, %v1110_v55, %v1093_v59  ;;  %v1430_v0 = vrot.slane %v2660_v58, 2 }
  0xf1   : > { %2513 = vrot.lane.b32.xlu0 %v2512_v38, %s2735_s7  ;;  %v2507_v8 = vpack.i.bf16 %v1129_v56, %v1073_v26  ;;  %v1080_v7 = vrot.slane %v1065_v27, 4  ;;  %v3398_v61 = vperm.slane %v1055_v51, %v2869_v31  ;;  %v3401_v12 = vperm.slane %v1111_v60, %v2869_v31  ;;  %v2661_v38 = vld [vmem:[%s2813_s28] sm:$0xff] }
  0xf2   : > { %v2502_v21 = vpack.i.bf16 %v1121_v40, %v1065_v27  ;;  %v1136_v48 = vrot.slane %v1121_v40, 4  ;;  %v1082_v59 = vrot.slane %v1073_v26, 4  ;;  %v1138_v29 = vrot.slane %v1129_v56, 4  ;;  %v2429_v52 = vpop.permute.xlu2 %2428  ;;  %v2662_v56 = vld [vmem:[%s2813_s28 + $0x8] sm:$0xff]  ;;  %v2663_v40 = vld [vmem:[%s2813_s28 + $0x10] sm:$0x3] }
  0xf3   : > { %2508 = vrot.lane.b32.xlu1 %v2507_v8, %s2731_s30  ;;  %v1078_v4 = vrot.slane %v3398_v61, 4  ;;  %v1134_v28 = vrot.slane %v3401_v12, 4  ;;  %v1081_v23 = vsel %vm182_vm0, 0.0, %v1080_v7  ;;  %v1432_v57 = vrot.slane %v2931_v33, 2 }
  0xf4   : > { %v1137_v32 = vsel %vm182_vm0, 0.0, %v1136_v48  ;;  %v1083_v54 = vsel %vm182_vm0, 0.0, %v1082_v59  ;;  %v1139_v25 = vsel %vm182_vm0, 0.0, %v1138_v29  ;;  %v3420_v24 = vsel %vm1418_vm2, %v1429_v1, %v1430_v0  ;;  %v3471_v59 = vpop.permute.xlu0 %2413 }
  0xf5   : > { %2503 = vrot.lane.b32.xlu2 %v2502_v21, %s2732_s4  ;;  %v1079_v9 = vsel %vm182_vm0, 0.0, %v1078_v4  ;;  %v1135_v11 = vsel %vm182_vm0, 0.0, %v1134_v28  ;;  %v2522_v50 = vpack.i.bf16 %v1137_v32, %v1081_v23  ;;  %v3423_v62 = vsel %vm1418_vm2, %v1430_v0, %v1432_v57 }
  0xf6   : > { %v2517_v5 = vpack.i.bf16 %v1135_v11, %v1079_v9  ;;  %v1084_v49 = vrot.slane %v1077_v2, 4  ;;  %v1140_v20 = vrot.slane %v1133_v37, 4  ;;  %v2532_v18 = vpack.i.bf16 %v1139_v25, %v1083_v54 }
  0xf7   : > { %v2527_v33 = vpack.i.bf16 %v3423_v62, %v3420_v24  ;;  %v2431_v55 = vunpack.i.h.bf16 %v2429_v52  ;;  %v2430_v42 = vunpack.i.l.bf16 %v2429_v52  ;;  %v2421_v53 = vunpack.i.h.bf16 %v2419_v6 }
  0xf8   : > { %v1085_v17 = vsel %vm182_vm0, 0.0, %v1084_v49  ;;  %v1141_v35 = vsel %vm182_vm0, 0.0, %v1140_v20  ;;  %v2420_v19 = vunpack.i.l.bf16 %v2419_v6  ;;  %v1419_v26 = vrot.slane %v2661_v38, 2 }
  0xf9   : > { %2523 = vrot.lane.b32.xlu0 %v2522_v50, %s2733_s5  ;;  %v2537_v2 = vpack.i.bf16 %v1141_v35, %v1085_v17  ;;  %v1723_v37 = vrot.slane %v2431_v55, 4  ;;  %v1667_v16 = vrot.slane %v2430_v42, 4  ;;  %v1420_v27 = vrot.slane %v2662_v56, 2 }
  0xfa   : > { %v1422_v51 = vrot.slane %v2663_v40, 2  ;;  %v1721_v60 = vrot.slane %v2421_v53, 4  ;;  %v1665_v7 = vrot.slane %v2420_v19, 4 }
  0xfb   : > { %2518 = vrot.lane.b32.xlu1 %v2517_v5, %s2734_s6  ;;  %v3439_v8 = vsel %vm182_vm0, %v2421_v53, %v1723_v37  ;;  %v3442_v21 = vsel %vm182_vm0, %v2420_v19, %v1667_v16  ;;  %v3453_v28 = vsel %vm1418_vm2, %v1419_v26, %v1420_v27 }
  0xfc   : > { %v3447_v48 = vsel %vm182_vm0, %v1721_v60, %v2431_v55  ;;  %v3450_v4 = vsel %vm182_vm0, %v1665_v7, %v2430_v42  ;;  %v3456_v23 = vsel %vm1418_vm2, %v1420_v27, %v1422_v51  ;;  %v3473_v1 = vpop.permute.xlu0 %1849 }
  0xfd   : > { %2533 = vrot.lane.b32.xlu2 %v2532_v18, %s2737_s9  ;;  %v2547_v32 = vpack.i.bf16 %v3456_v23, %v3453_v28 }
 0x101   : > { %2528 = vrot.lane.b32.xlu0 %v2527_v33, %s2730_s29 }
 0x103   : > { %2538 = vrot.lane.b32.xlu1 %v2537_v2, %s2736_s8 }
 0x105   : > { %1841 = vrot.lane.b32.xlu2 %v3102_v47, %s2738_s10 }
 0x109   : > { %1843 = vrot.lane.b32.xlu0 %v3420_v24, %s2738_s10 }
 0x10b   : > { %1839 = vrot.lane.b32.xlu1 %v3098_v44, %s2738_s10 }
 0x10d   : > { %2543 = vrot.lane.b32.xlu2 %v3062_v39, %s2738_s10  ;;  %v3475_v39 = vpop.permute.xlu1 %2423 }
 0x111   : > { %2548 = vrot.lane.b32.xlu0 %v2547_v32, %s2730_s29  ;;  %s2145_s29 = scalar_lea.hbm %s4175_s3, %s2224_s26 }
 0x113   : > { %1845 = vrot.lane.b32.xlu1 %v3423_v62, %s2738_s10 }
 0x115   : > { %1837 = vrot.lane.b32.xlu2 %v3456_v23, %s2738_s10 }
 0x11b   : > { %1835 = vrot.lane.b32.xlu1 %v3453_v28, %s2738_s10  ;;  %v2439_v29 = vpop.permute.xlu2 %2438  ;;  %s2684_s10 = scalar_lea.hbm %s4175_s3, 32 }
 0x11c   : > { %v2441_v2 = vunpack.i.h.bf16 %v2439_v29  ;;  %v2440_v37 = vunpack.i.l.bf16 %v2439_v29 }
 0x12f   : > { %v2449_v63 = vpop.permute.xlu2 %2448 }
 0x135   : > { %v2444_v5 = vpop.permute.xlu1 %2443 }
 0x136   : > { %v2446_v38 = vunpack.i.h.bf16 %v2444_v5  ;;  %v2445_v26 = vunpack.i.l.bf16 %v2444_v5  ;;  %v2451_v5 = vunpack.i.h.bf16 %v2449_v63 }
 0x137   : > { %v2464_v9 = vpop.permute.xlu2 %2463 }
 0x138   : > { %v2466_v11 = vunpack.i.h.bf16 %v2464_v9  ;;  %v2465_v58 = vunpack.i.l.bf16 %v2464_v9 }
 0x13a   : > { %v578_v0 = vsel %vm350_vm3, %v3269_v30, %v2466_v11  ;;  %v571_v57 = vsel %vm350_vm3, %v3266_v22, %v2465_v58  ;;  %v2434_v50 = vpop.permute.xlu0 %2433 }
 0x13b   : > { %v2436_v54 = vunpack.i.h.bf16 %v2434_v50  ;;  %v2435_v25 = vunpack.i.l.bf16 %v2434_v50 }
 0x13d   : > { %v572_v49 = vsel %vm352_vm4, %v571_v57, %v2435_v25  ;;  %v579_v20 = vsel %vm352_vm4, %v578_v0, %v2436_v54 }
 0x13f   : > { %v2479_v18 = vpop.permute.xlu2 %2478 }
 0x140   : > { %v2481_v40 = vunpack.i.h.bf16 %v2479_v18  ;;  %v2480_v51 = vunpack.i.l.bf16 %v2479_v18 }
 0x143   : > { %v3483_v33 = vpop.permute.xlu0 %2458 }
 0x145   : > { %v2454_v17 = vpop.permute.xlu1 %2453 }
 0x147   : > { %v2494_v35 = vpop.permute.xlu2 %2493 }
 0x14b   : > { %v2474_v52 = vpop.permute.xlu0 %2473 }
 0x14c   : > { %v2476_v16 = vunpack.i.h.bf16 %v2474_v52  ;;  %v2475_v6 = vunpack.i.l.bf16 %v2474_v52 }
 0x14d   : > { %v2469_v55 = vpop.permute.xlu1 %2468 }
 0x14e   : > { %v2471_v42 = vunpack.i.h.bf16 %v2469_v55  ;;  %v2470_v30 = vunpack.i.l.bf16 %v2469_v55 }
 0x14f   : > { %v3485_v22 = vpop.permute.xlu2 %2503 }
 0x150   : > { %v573_v53 = vsel %vm354_vm5, %v572_v49, %v2470_v30  ;;  %v580_v19 = vsel %vm354_vm5, %v579_v20, %v2471_v42  ;;  %v2450_v49 = vunpack.i.l.bf16 %v2449_v63  ;;  %v2455_v63 = vunpack.i.l.bf16 %v2454_v17 }
 0x151   : > { %v574_v56 = vsel %vm356_vm6, %v573_v53, %v2440_v37  ;;  %v581_v27 = vsel %vm356_vm6, %v580_v19, %v2441_v2  ;;  %v2456_v37 = vunpack.i.h.bf16 %v2454_v17  ;;  %v2495_v53 = vunpack.i.l.bf16 %v2494_v35 }
 0x152   : > { %v575_v60 = vsel %vm358_vm7, %v574_v56, %v2475_v6  ;;  %v582_v7 = vsel %vm358_vm7, %v581_v27, %v2476_v16  ;;  %v2416_v17 = vunpack.i.h.bf16 %v3471_v59  ;;  %v2415_v56 = vunpack.i.l.bf16 %v3471_v59 }
 0x153   : > { %v576_v32 = vsel %vm360_vm8, %v575_v60, %v2445_v26  ;;  %v583_v29 = vsel %vm360_vm8, %v582_v7, %v2446_v38  ;;  %v2489_v58 = vpop.permute.xlu0 %2488  ;;  %v2461_v38 = vunpack.i.h.bf16 %v3483_v33  ;;  %v2460_v26 = vunpack.i.l.bf16 %v3483_v33 }
 0x154   : > { %v577_v9 = vsel %vm362_vm9, %v576_v32, %v2480_v51  ;;  %v584_v11 = vsel %vm362_vm9, %v583_v29, %v2481_v40  ;;  %v2491_v55 = vunpack.i.h.bf16 %v2489_v58  ;;  %v2490_v42 = vunpack.i.l.bf16 %v2489_v58 }
 0x155   : > { %v2484_v0 = vpop.permute.xlu1 %2483  ;;  %v2043_v57 = vrot.slane %v577_v9, 4  ;;  %v2044_v50 = vrot.slane %v584_v11, 4  ;;  %v2426_v40 = vunpack.i.h.bf16 %v3475_v39  ;;  %v2425_v51 = vunpack.i.l.bf16 %v3475_v39 }
 0x156   : > { %v2486_v54 = vunpack.i.h.bf16 %v2484_v0  ;;  %v2485_v25 = vunpack.i.l.bf16 %v2484_v0  ;;  %v2049_v11 = vrot.slane %v3346_v36, 4  ;;  %v2050_v59 = vrot.slane %v3364_v46, 4 }
 0x157   : > { %v3497_v20 = vpop.permute.xlu2 %2533  ;;  %v3501_v18 = vsel %vm2065_vm10, %v3137_v13, %v2043_v57  ;;  %v3505_v52 = vsel %vm2065_vm10, %v3140_v14, %v2044_v50  ;;  %v2496_v13 = vunpack.i.h.bf16 %v2494_v35  ;;  %v1248_v58 = vrot.slane %v2416_v17, 4 }
 0x158   : > { %4182 = vst [vmem:[#allocation5_spill] sm:$0xff] %v3501_v18  ;;  %v784_v30 = vsel %vm350_vm3, %v3322_v15, %v2486_v54  ;;  %v777_v2 = vsel %vm350_vm3, %v3319_v3, %v2485_v25  ;;  %v1250_v0 = vrot.slane %v2415_v56, 4  ;;  %v1306_v39 = vrot.slane %v2426_v40, 4 }
 0x159   : > { %4183 = vst [vmem:[#allocation6_spill] sm:$0xff] %v3505_v52  ;;  %v785_v16 = vsel %vm352_vm4, %v784_v30, %v2451_v5  ;;  %v778_v6 = vsel %vm352_vm4, %v777_v2, %v2450_v49  ;;  %v1304_v54 = vrot.slane %v2425_v51, 4  ;;  %v1459_v49 = vrot.slane %v3080_v41, 4 }
 0x15a   : > { %v786_v19 = vsel %vm354_vm5, %v785_v16, %v2491_v55  ;;  %v779_v14 = vsel %vm354_vm5, %v778_v6, %v2490_v42  ;;  %v2411_v36 = vunpack.i.h.bf16 %v3376_v34  ;;  %v2410_v46 = vunpack.i.l.bf16 %v3376_v34 }
 0x15b   : > { %v780_v15 = vsel %vm356_vm6, %v779_v14, %v2455_v63  ;;  %v787_v3 = vsel %vm356_vm6, %v786_v19, %v2456_v37  ;;  %v1249_v42 = vsel %vm182_vm0, %v1248_v58, %v2415_v56  ;;  %v1251_v30 = vsel %vm182_vm0, %v2416_v17, %v1250_v0 }
 0x15c   : > { %v781_v27 = vsel %vm358_vm7, %v780_v15, %v2495_v53  ;;  %v788_v35 = vsel %vm358_vm7, %v787_v3, %v2496_v13  ;;  %v1515_v2 = vrot.slane %v3083_v45, 4  ;;  %v1305_v37 = vsel %vm182_vm0, %v1304_v54, %v2426_v40 }
 0x15d   : > { %v2499_v60 = vpop.permute.xlu1 %2498  ;;  %v782_v7 = vsel %vm360_vm8, %v781_v27, %v2460_v26  ;;  %v789_v33 = vsel %vm360_vm8, %v788_v35, %v2461_v38  ;;  %v1307_v63 = vsel %vm182_vm0, %v2425_v51, %v1306_v39  ;;  %v1460_v6 = vsel %vm182_vm0, %v1459_v49, %v3098_v44 }
 0x15e   : > { %v2501_v32 = vunpack.i.h.bf16 %v2499_v60  ;;  %v2500_v29 = vunpack.i.l.bf16 %v2499_v60  ;;  %v1294_v13 = vrot.slane %v2411_v36, 4  ;;  %v1238_v53 = vrot.slane %v2410_v46, 4 }
 0x15f   : > { %v3527_v9 = vpop.permute.xlu2 %1841  ;;  %v1255_v34 = vperm.slane %v1249_v42, %v2838_v10  ;;  %v3555_v19 = vperm.slane %v1251_v30, %v2838_v10  ;;  %v1311_v38 = vperm.slane %v1305_v37, %v2838_v10  ;;  %v3559_v26 = vperm.slane %v1307_v63, %v2838_v10 }
 0x160   : > { %v783_v57 = vsel %vm362_vm9, %v782_v7, %v2500_v29  ;;  %v790_v50 = vsel %vm362_vm9, %v789_v33, %v2501_v32  ;;  %v3562_v17 = vperm.slane %v1460_v6, %v2838_v10  ;;  %v1516_v56 = vsel %vm182_vm0, %v1515_v2, %v3102_v47 }
 0x161   : > { %v3534_v25 = vsel %vm2065_vm10, %v783_v57, %v2049_v11  ;;  %v3537_v5 = vsel %vm2065_vm10, %v790_v50, %v2050_v59  ;;  %v1503_v27 = vrot.slane %v3423_v62, 4  ;;  %v1447_v35 = vrot.slane %v3420_v24, 4 }
 0x162   : > { %4184 = vst [vmem:[#allocation7_spill] sm:$0xff] %v3534_v25  ;;  %v1260_v33 = vrot.slane %v1255_v34, 4  ;;  %v1272_v32 = vrot.slane %v3555_v19, 4  ;;  %v1316_v58 = vrot.slane %v1311_v38, 4  ;;  %v1328_v0 = vrot.slane %v3559_v26, 4 }
 0x163   : > { %4185 = vst [vmem:[#allocation8_spill] sm:$0xff] %v3537_v5  ;;  %v3542_v55 = vpop.permute.xlu0 %2513  ;;  %v2506_v39 = vunpack.i.h.bf16 %v3485_v22  ;;  %v2505_v54 = vunpack.i.l.bf16 %v3485_v22 }
 0x165   : > { %v3549_v16 = vpop.permute.xlu1 %2508 }
 0x167   : > { %v2544_v14 = vpop.permute.xlu2 %2543 }
 0x168   : > { %v2546_v15 = vunpack.i.h.bf16 %v2544_v14  ;;  %v2545_v3 = vunpack.i.l.bf16 %v2544_v14 }
 0x16a   : > { %v1292_v40 = vrot.slane %v2546_v15, 4  ;;  %v1295_v51 = vsel %vm182_vm0, %v2546_v15, %v1294_v13  ;;  %v1236_v60 = vrot.slane %v2545_v3, 4  ;;  %v1239_v7 = vsel %vm182_vm0, %v2545_v3, %v1238_v53 }
 0x16b   : > { %v1303_v29 = vperm.slane %v1295_v51, %v2838_v10  ;;  %v1247_v11 = vperm.slane %v1239_v7, %v2838_v10  ;;  %v2524_v59 = vpop.permute.xlu0 %2523 }
 0x16c   : > { %v1293_v57 = vsel %vm182_vm0, %v1292_v40, %v2411_v36  ;;  %v1237_v50 = vsel %vm182_vm0, %v1236_v60, %v2410_v46  ;;  %v2526_v22 = vunpack.i.h.bf16 %v2524_v59  ;;  %v2525_v14 = vunpack.i.l.bf16 %v2524_v59 }
 0x16d   : > { %v1299_v49 = vperm.slane %v1293_v57, %v2838_v10  ;;  %v1243_v42 = vperm.slane %v1237_v50, %v2838_v10  ;;  %v2519_v30 = vpop.permute.xlu1 %2518  ;;  %v1273_v63 = vsel %vm182_vm0, %v1272_v32, %v1247_v11  ;;  %v1329_v6 = vsel %vm182_vm0, %v1328_v0, %v1303_v29 }
 0x16e   : > { %v2521_v2 = vunpack.i.h.bf16 %v2519_v30  ;;  %v2520_v37 = vunpack.i.l.bf16 %v2519_v30  ;;  %v1448_v40 = vsel %vm182_vm0, %v1447_v35, %v3453_v28  ;;  %v3611_v0 = vperm.slane %v1273_v63, %v2869_v31 }
 0x16f   : > { %v1318_v13 = vrot.slane %v1299_v49, 4  ;;  %v1262_v53 = vrot.slane %v1243_v42, 4  ;;  %v3583_v36 = vsel %vm182_vm0, %v1260_v33, %v1243_v42  ;;  %v3586_v46 = vsel %vm182_vm0, %v1316_v58, %v1299_v49 }
 0x170   : > { %v1205_v15 = vsel %vm350_vm3, %v3401_v12, %v2521_v2  ;;  %v1198_v3 = vsel %vm350_vm3, %v3398_v61, %v2520_v37  ;;  %v3598_v33 = vperm.slane %v1516_v56, %v2838_v10  ;;  %v1504_v61 = vsel %vm182_vm0, %v1503_v27, %v3456_v23 }
 0x171   : > { %v1199_v51 = vsel %vm352_vm4, %v1198_v3, %v2505_v54  ;;  %v1206_v60 = vsel %vm352_vm4, %v1205_v15, %v2506_v39  ;;  %v1263_v7 = vsel %vm182_vm0, %v1255_v34, %v1262_v53  ;;  %v1319_v58 = vsel %vm182_vm0, %v1311_v38, %v1318_v13 }
 0x172   : > { %v1200_v32 = vsel %vm354_vm5, %v1199_v51, %v2525_v14  ;;  %v1207_v59 = vsel %vm354_vm5, %v1206_v60, %v2526_v22  ;;  %v3603_v12 = vperm.slane %v1263_v7, %v2869_v31  ;;  %v3614_v34 = vperm.slane %v1329_v6, %v2869_v31 }
 0x173   : > { %v3607_v35 = vpop.permute.xlu0 %2528  ;;  %v3617_v56 = vperm.slane %v1448_v40, %v2838_v10  ;;  %v1330_v57 = vrot.slane %v1303_v29, 4  ;;  %v1274_v50 = vrot.slane %v1247_v11, 4  ;;  %v3620_v39 = vperm.slane %v1319_v58, %v2869_v31 }
 0x174   : > { %v1927_v27 = vrot.slane %v3473_v1, 4  ;;  %v1286_v49 = vrot.slane %v3603_v12, 4  ;;  %v1288_v42 = vrot.slane %v3611_v0, 4  ;;  %v2535_v30 = vunpack.i.l.bf16 %v3497_v20 }
 0x175   : > { %v2539_v54 = vpop.permute.xlu1 %2538  ;;  %v2515_v2 = vunpack.i.l.bf16 %v3542_v55  ;;  %v2511_v29 = vunpack.i.h.bf16 %v3549_v16  ;;  %v2510_v11 = vunpack.i.l.bf16 %v3549_v16  ;;  %v1342_v13 = vrot.slane %v3620_v39, 4 }
 0x176   : > { %v2540_v37 = vunpack.i.l.bf16 %v2539_v54  ;;  %v3634_v6 = vsel %vm182_vm0, 0.0, %v1286_v49  ;;  %v3638_v53 = vsel %vm182_vm0, 0.0, %v1288_v42  ;;  %v1344_v22 = vrot.slane %v3614_v34, 4 }
 0x177   : > { %v1275_v14 = vsel %vm182_vm0, %v3555_v19, %v1274_v50  ;;  %v1331_v16 = vsel %vm182_vm0, %v3559_v26, %v1330_v57  ;;  %v3646_v15 = vsel %vm182_vm0, 0.0, %v1342_v13  ;;  %v1201_v51 = vsel %vm356_vm6, %v1200_v32, %v2510_v11 }
 0x178   : > { %v3649_v3 = vperm.slane %v1275_v14, %v2869_v31  ;;  %v3652_v40 = vperm.slane %v1331_v16, %v2869_v31  ;;  %v3658_v7 = vsel %vm182_vm0, 0.0, %v1344_v22  ;;  %v1202_v19 = vsel %vm358_vm7, %v1201_v51, %v2535_v30 }
 0x179   : > { %v1208_v26 = vsel %vm356_vm6, %v1207_v59, %v2511_v29  ;;  %v2536_v58 = vunpack.i.h.bf16 %v3497_v20  ;;  %v1471_v50 = vrot.slane %v3562_v17, 4  ;;  %v2516_v42 = vunpack.i.h.bf16 %v3542_v55 }
 0x17a   : > { %v1290_v11 = vrot.slane %v3649_v3, 4  ;;  %v1346_v30 = vrot.slane %v3652_v40, 4  ;;  %v1203_v59 = vsel %vm360_vm8, %v1202_v19, %v2515_v2  ;;  %v2541_v29 = vunpack.i.h.bf16 %v2539_v54 }
 0x17b   : > { %v3663_v57 = vpop.permute.xlu0 %1843  ;;  %v1472_v13 = vsel %vm182_vm0, %v1471_v50, %v3617_v56  ;;  %v3679_v22 = vsel %vm362_vm9, %v1203_v59, %v2540_v37  ;;  %v1209_v14 = vsel %vm358_vm7, %v1208_v26, %v2536_v58  ;;  %v1928_v55 = vsel %vm182_vm0, %v1927_v27, %v3527_v9 }
 0x17c   : > { %4186 = vst [vmem:[#allocation9_spill] sm:$0xff] %v3679_v22  ;;  %v2531_v16 = vunpack.i.h.bf16 %v3607_v35  ;;  %v3686_v51 = vsel %vm182_vm0, 0.0, %v1290_v11  ;;  %v3689_v54 = vsel %vm182_vm0, 0.0, %v1346_v30  ;;  %v1210_v2 = vsel %vm360_vm8, %v1209_v14, %v2516_v42 }
 0x17d   : > { %v3674_v20 = vpop.permute.xlu1 %1839  ;;  %4187 = vst [vmem:[#allocation10_spill] sm:$0xff] %v3686_v51  ;;  %v3693_v19 = vperm.slane %v1504_v61, %v2838_v10  ;;  %v2530_v37 = vunpack.i.l.bf16 %v3607_v35  ;;  %v1527_v26 = vrot.slane %v3598_v33, 4  ;;  %v1728_v58 = vperm.slane %v3447_v48, %v2838_v10 }
 0x17e   : > { %4188 = vst [vmem:[#allocation11_spill] sm:$0xff] %v3689_v54  ;;  %v1672_v50 = vperm.slane %v3450_v4, %v2838_v10  ;;  %v3704_v11 = vperm.slane %v1928_v55, %v2838_v10  ;;  %v3707_v42 = vsel %vm362_vm9, %v1210_v2, %v2541_v29  ;;  %v1871_v61 = vrot.slane %v3408_v43, 4 }
 0x17f   : > { %4189 = vst [vmem:[#allocation12_spill] sm:$0xff] %v3707_v42  ;;  %v3712_v35 = vperm.slane %v3439_v8, %v2838_v10  ;;  %v1709_v30 = vrot.slane %v2531_v16, 4  ;;  %v3716_v48 = vperm.slane %v3583_v36, %v2869_v31  ;;  %v3720_v4 = vperm.slane %v3586_v46, %v2869_v31  ;;  %v3747_v42 = vpop.permute.xlu2 %1837 }
 0x180   : > { %v1653_v14 = vrot.slane %v2530_v37, 4  ;;  %v1528_v2 = vsel %vm182_vm0, %v1527_v26, %v3693_v19  ;;  %v1733_v27 = vrot.slane %v1728_v58, 4  ;;  %v3726_v8 = vperm.slane %v3442_v21, %v2838_v10 }
 0x181   : > { %4190 = vst [vmem:[#allocation13_spill] sm:$0xff] %v3716_v48  ;;  %v1677_v32 = vrot.slane %v1672_v50, 4  ;;  %v1939_v49 = vrot.slane %v3704_v11, 4  ;;  %v1872_v46 = vsel %vm182_vm0, %v1871_v61, %v3674_v20  ;;  %v3736_v60 = vperm.slane %v1472_v13, %v2869_v31 }
 0x182   : > { %4191 = vst [vmem:[#allocation14_spill] sm:$0xff] %v3720_v4  ;;  %v3742_v52 = vperm.slane %v1528_v2, %v2869_v31  ;;  %v1859_v18 = vrot.slane %v3663_v57, 4  ;;  %v1284_v61 = vrot.slane %v3716_v48, 4 }
 0x183   : > { %v2549_v59 = vpop.permute.xlu0 %2548 }
 0x184   : > { %v2551_v55 = vunpack.i.h.bf16 %v2549_v59  ;;  %v2550_v29 = vunpack.i.l.bf16 %v2549_v59  ;;  %v1551_v51 = vrot.slane %v3742_v52, 4 }
 0x185   : > { %v3729_v36 = vpop.permute.xlu1 %1845 }
 0x186   : > { %v1654_v38 = vsel %vm182_vm0, %v1653_v14, %v2550_v29  ;;  %v1710_v59 = vsel %vm182_vm0, %v1709_v30, %v2551_v55  ;;  %v1915_v63 = vrot.slane %v3729_v36, 4  ;;  %v1711_v5 = vrot.slane %v2551_v55, 4 }
 0x187   : > { %v1660_v26 = vperm.slane %v1654_v38, %v2838_v10  ;;  %v1716_v21 = vperm.slane %v1710_v59, %v2838_v10  ;;  %v1340_v14 = vrot.slane %v3720_v4, 4  ;;  %v1655_v30 = vrot.slane %v2550_v29, 4 }
 0x188   : > { %v1473_v38 = vrot.slane %v3617_v56, 4  ;;  %v3751_v59 = vperm.slane %v1872_v46, %v2838_v10  ;;  %v1916_v2 = vsel %vm182_vm0, %v1915_v63, %v3747_v42  ;;  %v1495_v4 = vrot.slane %v3736_v60, 4 }
 0x189   : > { %v1679_v25 = vrot.slane %v1660_v26, 4  ;;  %v1735_v13 = vrot.slane %v1716_v21, 4  ;;  %v1678_v22 = vsel %vm182_vm0, %v1677_v32, %v1660_v26  ;;  %v1734_v55 = vsel %vm182_vm0, %v1733_v27, %v1716_v21 }
 0x18a   : > { %v3758_v48 = vperm.slane %v1916_v2, %v2838_v10  ;;  %v3766_v54 = vperm.slane %v1678_v22, %v2869_v31  ;;  %v3769_v63 = vperm.slane %v1734_v55, %v2869_v31  ;;  %v1656_v32 = vsel %vm182_vm0, %v2530_v37, %v1655_v30 }
 0x18b   : > { %v1680_v29 = vsel %vm182_vm0, %v1672_v50, %v1679_v25  ;;  %v1736_v46 = vsel %vm182_vm0, %v1728_v58, %v1735_v13  ;;  %v1712_v27 = vsel %vm182_vm0, %v2531_v16, %v1711_v5  ;;  %v1474_v50 = vsel %vm182_vm0, %v3562_v17, %v1473_v38 }
 0x18c   : > { %v1688_v56 = vperm.slane %v1680_v29, %v2869_v31  ;;  %v1744_v25 = vperm.slane %v1736_v46, %v2869_v31  ;;  %v1701_v22 = vrot.slane %v3766_v54, 4  ;;  %v1757_v21 = vrot.slane %v3769_v63, 4 }
 0x18d   : > { %v3773_v26 = vpop.permute.xlu1 %1835  ;;  %v1940_v13 = vsel %vm182_vm0, %v1939_v49, %v3758_v48  ;;  %v1883_v37 = vrot.slane %v3751_v59, 4  ;;  %v1664_v2 = vperm.slane %v1656_v32, %v2838_v10  ;;  %v1720_v55 = vperm.slane %v1712_v27, %v2838_v10 }
 0x18e   : > { %v1860_v58 = vsel %vm182_vm0, %v1859_v18, %v3773_v26  ;;  %v2557_v16 = vpack.i.bf16 %v1744_v25, %v1688_v56  ;;  %v1703_v30 = vrot.slane %v1688_v56, 4  ;;  %v1702_v17 = vsel %vm182_vm0, 0.0, %v1701_v22 }
 0x18f   : > { %v1866_v5 = vperm.slane %v1860_v58, %v2838_v10  ;;  %v1758_v38 = vsel %vm182_vm0, 0.0, %v1757_v21  ;;  %v1759_v18 = vrot.slane %v1744_v25, 4  ;;  %v3793_v46 = vperm.slane %v1940_v13, %v2869_v31 }
 0x190   : > { %2558 = vrot.lane.b32.xlu1 %v2557_v16, %s2732_s4  ;;  %v2552_v29 = vpack.i.bf16 %v1758_v38, %v1702_v17  ;;  %v1461_v58 = vrot.slane %v3098_v44, 4  ;;  %v3800_v32 = vsel %vm182_vm0, 0.0, %v1703_v30  ;;  %v1745_v27 = vrot.slane %v3712_v35, 4 }
 0x191   : > { %v1884_v49 = vsel %vm182_vm0, %v1883_v37, %v1866_v5  ;;  %v3803_v25 = vsel %vm182_vm0, 0.0, %v1759_v18  ;;  %v1689_v22 = vrot.slane %v3726_v8, 4  ;;  %v1285_v21 = vsel %vm182_vm0, 0.0, %v1284_v61 }
 0x192   : > { %v3797_v56 = vperm.slane %v1884_v49, %v2869_v31  ;;  %2553 = vrot.lane.b32.xlu0 %v2552_v29, %s2734_s6  ;;  %v2572_v44 = vpack.i.bf16 %v3803_v25, %v3800_v32  ;;  %v1341_v37 = vsel %vm182_vm0, 0.0, %v1340_v14  ;;  %v1496_v16 = vsel %vm182_vm0, 0.0, %v1495_v4 }
 0x193   : > { %v1552_v30 = vsel %vm182_vm0, 0.0, %v1551_v51  ;;  %v1963_v17 = vrot.slane %v3793_v46, 4  ;;  %v1529_v38 = vrot.slane %v3693_v19, 4  ;;  %v1690_v18 = vsel %vm182_vm0, %v1689_v22, %v1664_v2 }
 0x194   : > { %v1907_v13 = vrot.slane %v3797_v56, 4  ;;  %v1746_v29 = vsel %vm182_vm0, %v1745_v27, %v1720_v55  ;;  %v1482_v49 = vperm.slane %v1474_v50, %v2869_v31  ;;  %v3822_v32 = vperm.slane %v1690_v18, %v2869_v31 }
 0x195   : > { %v3825_v14 = vperm.slane %v1746_v29, %v2869_v31  ;;  %v1691_v4 = vrot.slane %v1664_v2, 4  ;;  %v1885_v51 = vrot.slane %v1866_v5, 4  ;;  %v2562_v25 = vpack.i.bf16 %v1341_v37, %v1285_v21 }
 0x196   : > { %v1908_v61 = vsel %vm182_vm0, 0.0, %v1907_v13  ;;  %v1530_v19 = vsel %vm182_vm0, %v3598_v33, %v1529_v38  ;;  %v1747_v22 = vrot.slane %v1720_v55, 4  ;;  %v1705_v13 = vrot.slane %v3822_v32, 4 }
 0x197   : > { %1972 = vrot.lane.b32.xlu2 %v1908_v61, %s2734_s6  ;;  %v1538_v27 = vperm.slane %v1530_v19, %v2869_v31  ;;  %v2587_v50 = vpack.i.bf16 %v3825_v14, %v3822_v32  ;;  %v1462_v18 = vsel %vm182_vm0, %v3080_v41, %v1461_v58  ;;  %v2567_v5 = vpack.i.bf16 %v1552_v30, %v1496_v16 }
 0x198   : > { %2563 = vrot.lane.b32.xlu1 %v2562_v25, %s2734_s6  ;;  %v1761_v2 = vrot.slane %v3825_v14, 4  ;;  %v1497_v21 = vrot.slane %v1482_v49, 4  ;;  %v1964_v37 = vsel %vm182_vm0, 0.0, %v1963_v17  ;;  %v3840_v55 = vsel %vm182_vm0, 0.0, %v1705_v13 }
 0x199   : > { %v2582_v33 = vpack.i.bf16 %v1538_v27, %v1482_v49  ;;  %v1553_v38 = vrot.slane %v1538_v27, 4  ;;  %v1886_v29 = vsel %vm182_vm0, %v3751_v59, %v1885_v51  ;;  %v1692_v16 = vsel %vm182_vm0, %v3726_v8, %v1691_v4 }
 0x19a   : > { %2000 = vrot.lane.b32.xlu0 %v1964_v37, %s2734_s6  ;;  %v3846_v41 = vsel %vm182_vm0, 0.0, %v1761_v2  ;;  %v3849_v58 = vsel %vm182_vm0, 0.0, %v1497_v21  ;;  %v3859_v61 = vperm.slane %v1692_v16, %v2869_v31  ;;  %v1748_v59 = vsel %vm182_vm0, %v3712_v35, %v1747_v22 }
 0x19b   : > { %v2602_v30 = vpack.i.bf16 %v3846_v41, %v3840_v55  ;;  %v3856_v17 = vsel %vm182_vm0, 0.0, %v1553_v38  ;;  %v3864_v49 = vperm.slane %v1462_v18, %v2838_v10  ;;  %v3869_v8 = vperm.slane %v1748_v59, %v2869_v31 }
 0x19c   : > { %v2597_v32 = vpack.i.bf16 %v3856_v17, %v3849_v58  ;;  %v1517_v14 = vrot.slane %v3102_v47, 4  ;;  %v1449_v4 = vrot.slane %v3453_v28, 4  ;;  %v1941_v51 = vrot.slane %v3758_v48, 4 }
 0x19d   : > { %v1707_v25 = vrot.slane %v3859_v61, 4  ;;  %v1505_v19 = vrot.slane %v3456_v23, 4  ;;  %v1894_v35 = vperm.slane %v1886_v29, %v2869_v31  ;;  %v2617_v22 = vpack.i.bf16 %v3869_v8, %v3859_v61 }
 0x19e   : > { %v1763_v27 = vrot.slane %v3869_v8, 4  ;;  %v1483_v28 = vrot.slane %v3864_v49, 4  ;;  %v1942_v23 = vsel %vm182_vm0, %v3704_v11, %v1941_v51  ;;  %v1450_v18 = vsel %vm182_vm0, %v3420_v24, %v1449_v4 }
 0x19f   : > { %2568 = vrot.lane.b32.xlu2 %v2567_v5, %s2734_s6  ;;  %v3882_v13 = vsel %vm182_vm0, 0.0, %v1707_v25  ;;  %v1506_v5 = vsel %vm182_vm0, %v3423_v62, %v1505_v19  ;;  %v1518_v2 = vsel %vm182_vm0, %v3083_v45, %v1517_v14  ;;  %v1458_v21 = vperm.slane %v1450_v18, %v2838_v10  ;;  %s2134_s6 = scalar_lea.sflag [#allocation3], %s161_s24 }
 0x1a0   : > { %1976 = vrot.lane.b32.xlu1 %v1894_v35, %s2732_s4  ;;  %v3886_v47 = vsel %vm182_vm0, 0.0, %v1763_v27  ;;  %v1514_v37 = vperm.slane %v1506_v5, %v2838_v10  ;;  %v1526_v11 = vperm.slane %v1518_v2, %v2838_v10  ;;  %v1950_v38 = vperm.slane %v1942_v23, %v2869_v31 }
 0x1a1   : > { %v2632_v48 = vpack.i.bf16 %v3886_v47, %v3882_v13  ;;  %v1484_v29 = vsel %vm182_vm0, %v1483_v28, %v1458_v21  ;;  %v4192_v16 = vpack.i.bf16 %v3620_v39, %v3603_v12  ;;  %v1873_v4 = vrot.slane %v3674_v20, 4 }
 0x1a2   : > { %2573 = vrot.lane.b32.xlu0 %v2572_v44, %s2733_s5  ;;  %v1539_v44 = vrot.slane %v1526_v11, 4  ;;  %v1490_v24 = vperm.slane %v1484_v29, %v2869_v31  ;;  %v1965_v14 = vrot.slane %v1950_v38, 4  ;;  %v1909_v51 = vrot.slane %v1894_v35, 4 }
 0x1a3   : > { %v1861_v25 = vrot.slane %v3773_v26, 4  ;;  %v1929_v28 = vrot.slane %v3527_v9, 4  ;;  %v1874_v23 = vsel %vm182_vm0, %v3408_v43, %v1873_v4  ;;  %v4193_v2 = vpack.i.bf16 %v3646_v15, %v3634_v6 }
 0x1a4   : > { %v1540_v62 = vsel %vm182_vm0, %v1539_v44, %v1514_v37  ;;  %v1499_v19 = vrot.slane %v1490_v24, 4  ;;  %v1910_v20 = vsel %vm182_vm0, 0.0, %v1909_v51  ;;  %v1882_v9 = vperm.slane %v1874_v23, %v2838_v10 }
 0x1a5   : > { %v1546_v45 = vperm.slane %v1540_v62, %v2869_v31  ;;  %v1862_v35 = vsel %vm182_vm0, %v3663_v57, %v1861_v25  ;;  %v1930_v43 = vsel %vm182_vm0, %v3473_v1, %v1929_v28  ;;  %v4194_v55 = vpack.i.bf16 %v3614_v34, %v3611_v0 }
 0x1a6   : > { %v1500_v12 = vsel %vm182_vm0, 0.0, %v1499_v19  ;;  %v1870_v18 = vperm.slane %v1862_v35, %v2838_v10  ;;  %v1895_v57 = vrot.slane %v1882_v9, 4  ;;  %v1485_v41 = vrot.slane %v1458_v21, 4 }
 0x1a7   : > { %2004 = vrot.lane.b32.xlu2 %v1950_v38, %s2732_s4  ;;  %v2612_v59 = vpack.i.bf16 %v1546_v45, %v1490_v24  ;;  %v1555_v27 = vrot.slane %v1546_v45, 4 }
 0x1a8   : > { %2583 = vrot.lane.b32.xlu1 %v2582_v33, %s2732_s4  ;;  %v1966_v33 = vsel %vm182_vm0, 0.0, %v1965_v14  ;;  %v1896_v38 = vsel %vm182_vm0, %v1895_v57, %v1870_v18  ;;  %v1486_v58 = vsel %vm182_vm0, %v3864_v49, %v1485_v41  ;;  %v4195_v14 = vpack.i.bf16 %v3658_v7, %v3638_v53 }
 0x1a9   : > { %v1556_v39 = vsel %vm182_vm0, 0.0, %v1555_v27  ;;  %v1902_v6 = vperm.slane %v1896_v38, %v2869_v31  ;;  %v1494_v29 = vperm.slane %v1486_v58, %v2869_v31  ;;  %v4196_v53 = vpack.i.bf16 %v3652_v40, %v3649_v3 }
 0x1aa   : > { %2578 = vrot.lane.b32.xlu0 %v4192_v16, %s2732_s4  ;;  %v2627_v26 = vpack.i.bf16 %v1556_v39, %v1500_v12 }
 0x1ab   : > { %v1501_v0 = vrot.slane %v1494_v29, 4 }
 0x1af   : > { %2588 = vrot.lane.b32.xlu2 %v2587_v50, %s2731_s30  ;;  %v1917_v50 = vrot.slane %v3747_v42, 4  ;;  %v1938_v42 = vperm.slane %v1930_v43, %v2838_v10 }
 0x1b0   : > { %2008 = vrot.lane.b32.xlu1 %v1966_v33, %s2733_s5 }
 0x1b1   : > { %v1918_v5 = vsel %vm182_vm0, %v3729_v36, %v1917_v50  ;;  %v1951_v36 = vrot.slane %v1938_v42, 4 }
 0x1b2   : > { %1980 = vrot.lane.b32.xlu0 %v1910_v20, %s2733_s5  ;;  %v1926_v1 = vperm.slane %v1918_v5, %v2838_v10 }
 0x1b4   : > { %v1952_v15 = vsel %vm182_vm0, %v1951_v36, %v1926_v1  ;;  %v1953_v16 = vrot.slane %v1926_v1, 4 }
 0x1b5   : > { %v1958_v10 = vperm.slane %v1952_v15, %v2869_v31 }
 0x1b6   : > { %v1954_v4 = vsel %vm182_vm0, %v1938_v42, %v1953_v16 }
 0x1b7   : > { %2593 = vrot.lane.b32.xlu2 %v4193_v2, %s2733_s5  ;;  %v1967_v62 = vrot.slane %v1958_v10, 4  ;;  %v1962_v61 = vperm.slane %v1954_v4, %v2869_v31  ;;  %v2075_v4 = vld [vmem:[%s4174_s2] sm:$0xff] }
 0x1b8   : > { %2603 = vrot.lane.b32.xlu1 %v2602_v30, %s2737_s9  ;;  %v1541_v30 = vrot.slane %v1514_v37, 4  ;;  %v1502_v37 = vsel %vm182_vm0, 0.0, %v1501_v0 }
 0x1b9   : > { %v1968_v45 = vsel %vm182_vm0, 0.0, %v1967_v62  ;;  %v1969_v13 = vrot.slane %v1962_v61, 4 }
 0x1ba   : > { %2598 = vrot.lane.b32.xlu0 %v2597_v32, %s2733_s5  ;;  %v1542_v17 = vsel %vm182_vm0, %v1526_v11, %v1541_v30  ;;  %v1911_v32 = vrot.slane %v1902_v6, 4  ;;  %s2149_s5 = sshll.u32 %s2145_s29, 4  ;;  %s2150_s5 = int_to_ptr.hbm [resolvable:$true] %s2149_s5 }
 0x1bb   : > { %v1550_v44 = vperm.slane %v1542_v17, %v2869_v31  ;;  %v1970_v47 = vsel %vm182_vm0, 0.0, %v1969_v13 }
 0x1bc   : > { %v1912_v21 = vsel %vm182_vm0, 0.0, %v1911_v32 }
 0x1bd   : > { %v2642_v24 = vpack.i.bf16 %v1550_v44, %v1494_v29  ;;  %v1557_v34 = vrot.slane %v1550_v44, 4 }
 0x1bf   : > { %1984 = vrot.lane.b32.xlu2 %v1902_v6, %s2731_s30  ;;  %v1558_v49 = vsel %vm182_vm0, 0.0, %v1557_v34 }
 0x1c0   : > { %2608 = vrot.lane.b32.xlu1 %v4194_v55, %s2731_s30  ;;  %v2652_v11 = vpack.i.bf16 %v1558_v49, %v1502_v37 }
 0x1c2   : > { %2012 = vrot.lane.b32.xlu0 %v1958_v10, %s2731_s30 }
 0x1c7   : > { %2613 = vrot.lane.b32.xlu2 %v2612_v59, %s2731_s30  ;;  %v1897_v59 = vrot.slane %v1870_v18, 4  ;;  %s163_s30 = scalar_lea.vmem [#allocation2], %s2213_s25 }
 0x1c8   : > { %1988 = vrot.lane.b32.xlu1 %v1912_v21, %s2737_s9  ;;  %s2147_s4 = sshll.u32 %s163_s30, 4  ;;  %s2148_s4 = int_to_ptr.vmem [resolvable:$true] %s2147_s4 }
 0x1c9   : > { %v1898_v51 = vsel %vm182_vm0, %v1882_v9, %v1897_v59 }
 0x1ca   : > { %2618 = vrot.lane.b32.xlu0 %v2617_v22, %s2735_s7  ;;  %v1906_v8 = vperm.slane %v1898_v51, %v2869_v31  ;;  %v4197_v31 = vld [vmem:[#allocation11_spill] sm:$0xff]  ;;  %v2739_v51 = vmov 0  }
 0x1cb   : > { %2657 = vset.pattern.permute.xlu2 %v2739_v51  ;;  %2658 = vset.pattern.permute.xlu0 %v2739_v51 }
 0x1cc   : > { %v1913_v22 = vrot.slane %v1906_v8, 4 }
 0x1ce   : > { %v1914_v7 = vsel %vm182_vm0, 0.0, %v1913_v22 }
 0x1cf   : > { %2016 = vrot.lane.b32.xlu2 %v1968_v45, %s2737_s9 }
 0x1d0   : > { %2628 = vrot.lane.b32.xlu1 %v2627_v26, %s2737_s9 }
 0x1d2   : > { %2623 = vrot.lane.b32.xlu0 %v4195_v14, %s2737_s9 }
 0x1d7   : > { %2633 = vrot.lane.b32.xlu2 %v2632_v48, %s2736_s8  ;;  %v4198_v48 = vld [vmem:[#allocation10_spill] sm:$0xff] }
 0x1d8   : > { %2020 = vrot.lane.b32.xlu1 %v1962_v61, %s2735_s7  ;;  %v4199_v25 = vpack.i.bf16 %v4197_v31, %v4198_v48 }
 0x1da   : > { %1992 = vrot.lane.b32.xlu0 %v1906_v8, %s2735_s7 }
 0x1df   : > { %2638 = vrot.lane.b32.xlu2 %v4196_v53, %s2735_s7 }
 0x1e0   : > { %1996 = vrot.lane.b32.xlu1 %v1914_v7, %s2736_s8 }
 0x1e2   : > { %2643 = vrot.lane.b32.xlu0 %v2642_v24, %s2735_s7  ;;  %s2678_s7 = sshra.s32 %s2150_s5, 4  ;;  %s2679_s7 = int_to_ptr.hbm [resolvable:$true] %s2678_s7 }
 0x1e3   : > { %s2680_s16 = scalar_lea.hbm %s2679_s7, 16  ;;  %p2685_p0 = scmp.lt.s32.totalorder %s2679_s7, %s4175_s3 }
 0x1e4   : > { %p2681_p11 = scmp.ne.s32.totalorder %s2679_s7, %s2680_s16  ;;  %p2686_p1 = scmp.lt.s32.totalorder %s2684_s10, %s2680_s16 }
 0x1e6   : > { %p2682_p12 = pnand %p2681_p11, %p2798_p5  ;;  %p2687_p2 = por %p2686_p1, %p2685_p0 }
 0x1e7   : > { %2024 = vrot.lane.b32.xlu2 %v1970_v47, %s2736_s8 }
 0x1e8   : > { %2653 = vrot.lane.b32.xlu1 %v2652_v11, %s2736_s8  ;;  %p2683_p13 = pneg %p2682_p12 }
 0x1ea   : > { %2648 = vrot.lane.b32.xlu0 %v4199_v25, %s2736_s8  ;;  %p2688_p3 = pnand %p2687_p2, %p2683_p13 }
 0x1ef   : > { %2078 = vperm.xlu2 %2657, %v2075_v4  }
 0x1f1   : > { %v1973_v3 = vpop.permute.xlu2 %1972 }
 0x1f2   : > { %v2027_v7 = vsel %vm350_vm3, %v3797_v56, %v1973_v3  ;;  %v4200_v3 = vld [vmem:[#allocation13_spill] sm:$0xff] }
 0x1f9   : > { %v4004_v40 = vpop.permute.xlu2 %2568 }
 0x1fa   : > { %v2571_v61 = vunpack.i.h.bf16 %v4004_v40 }
 0x201   : > { %v2005_v19 = vpop.permute.xlu2 %2004 }
 0x202   : > { %v2559_v27 = vpop.permute.xlu1 %2558 }
 0x203   : > { %v2561_v12 = vunpack.i.h.bf16 %v2559_v27  ;;  %v2560_v39 = vunpack.i.l.bf16 %v2559_v27 }
 0x204   : > { %v2554_v33 = vpop.permute.xlu0 %2553 }
 0x205   : > { %v2556_v28 = vunpack.i.h.bf16 %v2554_v33  ;;  %v2555_v23 = vunpack.i.l.bf16 %v2554_v33 }
 0x207   : > { %v1828_v20 = vsel %vm350_vm3, %v3769_v63, %v2556_v28  ;;  %v1821_v26 = vsel %vm350_vm3, %v3766_v54, %v2555_v23  ;;  %v1622_v28 = vsel %vm350_vm3, %v3742_v52, %v2571_v61 }
 0x208   : > { %v1822_v35 = vsel %vm352_vm4, %v1821_v26, %v2560_v39  ;;  %v1829_v9 = vsel %vm352_vm4, %v1828_v20, %v2561_v12  ;;  %v4201_v39 = vld [vmem:[#allocation14_spill] sm:$0xff] }
 0x209   : > { %v2589_v50 = vpop.permute.xlu2 %2588 }
 0x20a   : > { %v2564_v43 = vpop.permute.xlu1 %2563  ;;  %v2591_v38 = vunpack.i.h.bf16 %v2589_v50  ;;  %v2590_v36 = vunpack.i.l.bf16 %v2589_v50 }
 0x20b   : > { %v2565_v8 = vunpack.i.l.bf16 %v2564_v43  ;;  %v2566_v13 = vunpack.i.h.bf16 %v2564_v43 }
 0x20c   : > { %v2001_v18 = vpop.permute.xlu0 %2000 }
 0x20d   : > { %v2034_v62 = vsel %vm350_vm3, %v3793_v46, %v2001_v18  ;;  %v2570_v46 = vunpack.i.l.bf16 %v4004_v40  ;;  %v1404_v23 = vsel %vm350_vm3, %v4200_v3, %v2565_v8  ;;  %v1411_v20 = vsel %vm350_vm3, %v4201_v39, %v2566_v13 }
 0x20e   : > { %v2035_v16 = vsel %vm352_vm4, %v2034_v62, %v2005_v19 }
 0x20f   : > { %v1615_v56 = vsel %vm350_vm3, %v3736_v60, %v2570_v46 }
 0x211   : > { %v4012_v5 = vpop.permute.xlu2 %2593 }
 0x212   : > { %v1977_v2 = vpop.permute.xlu1 %1976  ;;  %v2596_v26 = vunpack.i.h.bf16 %v4012_v5  ;;  %v2595_v18 = vunpack.i.l.bf16 %v4012_v5 }
 0x213   : > { %v2028_v25 = vsel %vm352_vm4, %v2027_v7, %v1977_v2 }
 0x214   : > { %v2574_v42 = vpop.permute.xlu0 %2573 }
 0x215   : > { %v2576_v57 = vunpack.i.h.bf16 %v2574_v42  ;;  %v2575_v1 = vunpack.i.l.bf16 %v2574_v42 }
 0x217   : > { %v1830_v63 = vsel %vm354_vm5, %v1829_v9, %v2576_v57  ;;  %v1823_v6 = vsel %vm354_vm5, %v1822_v35, %v2575_v1 }
 0x218   : > { %v4017_v54 = vsel %vm356_vm6, %v1823_v6, %v2590_v36  ;;  %v4020_v15 = vsel %vm356_vm6, %v1830_v63, %v2591_v38 }
 0x219   : > { %v1985_v55 = vpop.permute.xlu2 %1984 }
 0x21a   : > { %v4022_v10 = vpop.permute.xlu1 %2583 }
 0x21b   : > { %v2586_v12 = vunpack.i.h.bf16 %v4022_v10  ;;  %v2585_v50 = vunpack.i.l.bf16 %v4022_v10 }
 0x21c   : > { %v2579_v41 = vpop.permute.xlu0 %2578 }
 0x21d   : > { %v2580_v47 = vunpack.i.l.bf16 %v2579_v41  ;;  %v2581_v19 = vunpack.i.h.bf16 %v2579_v41  ;;  %v1623_v1 = vsel %vm352_vm4, %v1622_v28, %v2586_v12  ;;  %v1616_v10 = vsel %vm352_vm4, %v1615_v56, %v2585_v50 }
 0x21f   : > { %v1405_v35 = vsel %vm352_vm4, %v1404_v23, %v2580_v47  ;;  %v1412_v9 = vsel %vm352_vm4, %v1411_v20, %v2581_v19 }
 0x220   : > { %v1413_v5 = vsel %vm354_vm5, %v1412_v9, %v2596_v26 }
 0x221   : > { %v4024_v58 = vpop.permute.xlu2 %2613 }
 0x222   : > { %v2009_v30 = vpop.permute.xlu1 %2008 }
 0x223   : > { %v2036_v59 = vsel %vm354_vm5, %v2035_v16, %v2009_v30  ;;  %v2616_v30 = vunpack.i.h.bf16 %v4024_v58 }
 0x224   : > { %v1981_v17 = vpop.permute.xlu0 %1980 }
 0x225   : > { %v2029_v40 = vsel %vm354_vm5, %v2028_v25, %v1981_v17  ;;  %v2615_v17 = vunpack.i.l.bf16 %v4024_v58 }
 0x226   : > { %v2030_v43 = vsel %vm356_vm6, %v2029_v40, %v1985_v55  ;;  %v1406_v55 = vsel %vm354_vm5, %v1405_v35, %v2595_v18  ;;  %v4202_v18 = vld [vmem:[#allocation9_spill] sm:$0xff] }
 0x229   : > { %v2017_v44 = vpop.permute.xlu2 %2016 }
 0x22a   : > { %v4026_v32 = vpop.permute.xlu1 %2603 }
 0x22b   : > { %v2606_v52 = vunpack.i.h.bf16 %v4026_v32  ;;  %v2605_v60 = vunpack.i.l.bf16 %v4026_v32 }
 0x22c   : > { %v4028_v29 = vpop.permute.xlu0 %2598 }
 0x22d   : > { %v2601_v2 = vunpack.i.h.bf16 %v4028_v29  ;;  %v2600_v42 = vunpack.i.l.bf16 %v4028_v29  ;;  %v1832_v32 = vsel %vm358_vm7, %v4020_v15, %v2606_v52  ;;  %v1825_v29 = vsel %vm358_vm7, %v4017_v54, %v2605_v60 }
 0x231   : > { %v4032_v34 = vpop.permute.xlu2 %2633 }
 0x232   : > { %v4030_v24 = vpop.permute.xlu1 %2608  ;;  %v2636_v54 = vunpack.i.h.bf16 %v4032_v34 }
 0x233   : > { %v2610_v62 = vunpack.i.l.bf16 %v4030_v24 }
 0x234   : > { %v2013_v0 = vpop.permute.xlu0 %2012 }
 0x235   : > { %v2037_v14 = vsel %vm356_vm6, %v2036_v59, %v2013_v0  ;;  %v1617_v0 = vsel %vm354_vm5, %v1616_v10, %v2600_v42  ;;  %v4203_v42 = vld [vmem:[#allocation12_spill] sm:$0xff] }
 0x236   : > { %v2038_v22 = vsel %vm358_vm7, %v2037_v14, %v2017_v44  ;;  %v2635_v14 = vunpack.i.l.bf16 %v4032_v34  ;;  %v1618_v61 = vsel %vm356_vm6, %v1617_v0, %v2615_v17 }
 0x239   : > { %v4036_v49 = vpop.permute.xlu2 %2638 }
 0x23a   : > { %v1989_v21 = vpop.permute.xlu1 %1988  ;;  %v2641_v34 = vunpack.i.h.bf16 %v4036_v49  ;;  %v2640_v13 = vunpack.i.l.bf16 %v4036_v49 }
 0x23b   : > { %v2031_v57 = vsel %vm358_vm7, %v2030_v43, %v1989_v21  ;;  %v1624_v21 = vsel %vm354_vm5, %v1623_v1, %v2601_v2  ;;  %v4204_v1 = vld [vmem:[#allocation7_spill] sm:$0xff] }
 0x23c   : > { %v4034_v37 = vpop.permute.xlu0 %2618 }
 0x23d   : > { %v2621_v38 = vunpack.i.h.bf16 %v4034_v37  ;;  %v2620_v36 = vunpack.i.l.bf16 %v4034_v37  ;;  %v2611_v37 = vunpack.i.h.bf16 %v4030_v24  ;;  %v1625_v24 = vsel %vm356_vm6, %v1624_v21, %v2616_v30 }
 0x23f   : > { %v1826_v16 = vsel %vm360_vm8, %v1825_v29, %v2620_v36  ;;  %v1833_v58 = vsel %vm360_vm8, %v1832_v32, %v2621_v38  ;;  %v4205_v38 = vld [vmem:[#allocation8_spill] sm:$0xff]  ;;  %v2074_v36 = vld [vmem:[%s4173_s1] sm:$0xff] }
 0x240   : > { %v1834_v7 = vsel %vm362_vm9, %v1833_v58, %v2636_v54 }
 0x241   : > { %v2025_v31 = vpop.permute.xlu2 %2024  ;;  %v2062_v3 = vrot.slane %v1834_v7, 4 }
 0x242   : > { %v4040_v11 = vpop.permute.xlu1 %2628 }
 0x243   : > { %v2631_v15 = vunpack.i.h.bf16 %v4040_v11  ;;  %v2630_v59 = vunpack.i.l.bf16 %v4040_v11  ;;  %v1827_v11 = vsel %vm362_vm9, %v1826_v16, %v2635_v14 }
 0x244   : > { %v4042_v45 = vpop.permute.xlu0 %2623  ;;  %v2061_v28 = vrot.slane %v1827_v11, 4 }
 0x245   : > { %v2626_v4 = vunpack.i.h.bf16 %v4042_v45  ;;  %v2625_v51 = vunpack.i.l.bf16 %v4042_v45  ;;  %v1619_v45 = vsel %vm358_vm7, %v1618_v61, %v2630_v59  ;;  %v1626_v47 = vsel %vm358_vm7, %v1625_v24, %v2631_v15 }
 0x249   : > { %v2079_v10 = vpop.permute.xlu2 %2078 }
 0x24a   : > { %v2021_v53 = vpop.permute.xlu1 %2020 }
 0x24b   : > { %v2039_v48 = vsel %vm360_vm8, %v2038_v22, %v2021_v53  ;;  %v1407_v22 = vsel %vm356_vm6, %v1406_v55, %v2610_v62  ;;  %v1414_v53 = vsel %vm356_vm6, %v1413_v5, %v2611_v37 }
 0x24c   : > { %v1993_v27 = vpop.permute.xlu0 %1992  ;;  %v2040_v33 = vsel %vm362_vm9, %v2039_v48, %v2025_v31  ;;  %v1408_v48 = vsel %vm358_vm7, %v1407_v22, %v2625_v51  ;;  %v1415_v25 = vsel %vm358_vm7, %v1414_v53, %v2626_v4 }
 0x24d   : > { %2217 = vmatpush.msk.msra.mxu1 %vm2065_vm10, %v2040_v33  ;;  %v2032_v63 = vsel %vm360_vm8, %v2031_v57, %v1993_v27  ;;  %v1409_v20 = vsel %vm360_vm8, %v1408_v48, %v2640_v13  ;;  %v1416_v26 = vsel %vm360_vm8, %v1415_v25, %v2641_v34 }
 0x252   : > { %v1997_v6 = vpop.permute.xlu1 %1996 }
 0x253   : > { %v2033_v41 = vsel %vm362_vm9, %v2032_v63, %v1997_v6  ;;  %v4206_v63 = vld [vmem:[#allocation5_spill] sm:$0xff]  ;;  %v4207_v6 = vld [vmem:[#allocation6_spill] sm:$0xff] }
 0x254   : > { %v2644_v44 = vpop.permute.xlu0 %2643  ;;  %2215 = vmatpush.msk.msra.mxu0 %vm2065_vm10, %v2033_v41 }
 0x255   : > { %v2646_v46 = vunpack.i.h.bf16 %v2644_v44  ;;  %v2645_v8 = vunpack.i.l.bf16 %v2644_v44 }
 0x257   : > { %v1620_v40 = vsel %vm360_vm8, %v1619_v45, %v2645_v8  ;;  %v1627_v56 = vsel %vm360_vm8, %v1626_v47, %v2646_v46 }
 0x25a   : > { %v2654_v31 = vpop.permute.xlu1 %2653 }
 0x25b   : > { %v2656_v19 = vunpack.i.h.bf16 %v2654_v31  ;;  %v2655_v27 = vunpack.i.l.bf16 %v2654_v31 }
 0x25c   : > { %v2649_v33 = vpop.permute.xlu0 %2648 }
 0x25d   : > { %v2651_v23 = vunpack.i.h.bf16 %v2649_v33  ;;  %v2650_v49 = vunpack.i.l.bf16 %v2649_v33  ;;  %v1621_v12 = vsel %vm362_vm9, %v1620_v40, %v2655_v27  ;;  %v1628_v39 = vsel %vm362_vm9, %v1627_v56, %v2656_v19 }
 0x25e   : > { %v2072_v50 = vsel %vm2065_vm10, %v1621_v12, %v2061_v28  ;;  %v2073_v35 = vsel %vm2065_vm10, %v1628_v39, %v2062_v3 }
 0x25f   : > { %v1410_v9 = vsel %vm362_vm9, %v1409_v20, %v2650_v49  ;;  %v1417_v52 = vsel %vm362_vm9, %v1416_v26, %v2651_v23  ;;  %2103 = vmatpush.msra.mxu0 %v2072_v50  ;;  %2123 = vmatpush.msra.mxu1 %v2073_v35 }
 0x260   : > { %v2055_v60 = vrot.slane %v1410_v9, 4  ;;  %v2056_v43 = vrot.slane %v1417_v52, 4 }
 0x262   : > { %v2070_v2 = vsel %vm2065_vm10, %v4202_v18, %v2055_v60  ;;  %v2071_v57 = vsel %vm2065_vm10, %v4203_v42, %v2056_v43 }
 0x263   : > { %2104 = vmatpush.msra.mxu0 %v2070_v2  ;;  %2124 = vmatpush.msra.mxu1 %v2071_v57 }
 0x265   : > { %2105 = vmatpush.msra.mxu0 %v4204_v1  ;;  %2125 = vmatpush.msra.mxu1 %v4205_v38 }
 0x267   : > { %2106 = vmatpush.msra.mxu0 %v4206_v63  ;;  %2126 = vmatpush.msra.mxu1 %v4207_v6 }
 0x268   : > { %2216 = vmatmul.msk.f32.vlgmr.msra.gmra.mxu0 %vm2081_vm11, %v2074_v36  ;;  %2218 = vmatmul.msk.f32.vlgmr.msra.gmra.mxu1 %vm2081_vm11, %v2074_v36 }
 0x2e5   : > { %v2108_v55 = vpop.f32.mrf.mxu0  ;;  %v2128_v5 = vpop.f32.mrf.mxu1 }
 0x2e6   : > { %v2109_v41 = vadd.f32 %v2108_v55, %v2079_v10  ;;  %v2129_v30 = vadd.f32 %v2128_v5, %v2079_v10 }
 0x2e8   : > { %2131 = vst [vmem:[%s163_s30] sm:$0xff] %v2109_v41 }
 0x2e9   : > { %2132 = vst [vmem:[%s163_s30 + $0x8] sm:$0xff] %v2129_v30 }
 0x2ea   : > { %2691 = shalt.err (!%p2688_p3)
}
 0x2eb   : > { %2226 = dma.vmem_to_hbm [thread:$0]  (%p2798_p5), %s2148_s4, 256, %s2150_s5, %s2134_s6  }
 0x2ec PF: > { %p2232_p4 = scmp.ge.s32.totalorder %s2726_s15, 2  ;;  %s2161_s19 = sand.u32 1, %s2714_s12  }
 0x2ed   : > { %s2162_s20 = scalar_lea.sflag [#allocation3], %s2161_s19 }
 0x2ee   : > { %p2229_p7 = pnand %p2232_p4, %p2802_p6 }
 0x2f0   : > { %p2230_p8 = pneg %p2229_p7 }
 0x2f2   : > { %2709 = dma.done.wait (%p2230_p8), %s2162_s20, 256  }
 0x2f3   : > { %2711 = vsyncadd (%p2230_p8), %s2162_s20, 4294967040  ;;  %p13_p9 = scmp.ge.s32.totalorder %s2785_s18, 4   ;;  %s4208_s12 = smov %s2718_s13 }
 0x2f4   : > { %s4209_s13 = smov %s2722_s14  ;;  %s4210_s14 = smov %s2796_s21 }
 0x2f5   : > { %s4211_s15 = smov %s2785_s18  ;;  %15 = sbr.rel (!%p13_p9) target bundleno = 3 (0x3), region = 67 }
 0x2fa   :  { %2168 = vsyncpa [#allocation3], 1 }
 0x2fb   :  { %2170 = vsyncpa [#allocation3 + $0x1], 1 }

</bundles_post_ra>
